<compile_context>
chip_gen: v7x
topology: tpu7x:2x2x1
jax: 0.10.0
libtpu: 0.0.40
codegen_flags: <defaults>
</compile_context>

<pallas_src>
import functools
import math

import jax
import jax.numpy as jnp
from jax.experimental import pallas as pl
from jax.experimental.pallas import tpu as pltpu


# ----------------------------- tile picking ---------------------------------
def _pick_tile(dim, target, align):
    """Largest tile <= target that divides dim (multiple of `align`)."""
    if dim <= target:
        return dim
    t = (target // align) * align
    while t >= align:
        if dim % t == 0:
            return t
        t -= align
    return dim  # fallback: single (full) block


# ----------------- fused QKV projection + RoPE-at-writeback ------------------
def _qkv_proj_rope_kernel(x_ref, wq_ref, wk_ref, wv_ref, bq_ref, bk_ref, bv_ref,
                          cq_ref, sq_ref, ck_ref, sk_ref,
                          q_ref, k_ref, v_ref,
                          accq, acck, accv,
                          *, compute_dtype, num_heads, num_kv_heads, head_dim):
    kk = pl.program_id(1)

    @pl.when(kk == 0)
    def _init():
        # accumulators start from the (pre-scaled) f32 biases
        accq[...] = jnp.broadcast_to(bq_ref[...], accq.shape)
        acck[...] = jnp.broadcast_to(bk_ref[...], acck.shape)
        accv[...] = jnp.broadcast_to(bv_ref[...], accv.shape)

    # In-kernel cast: x stays f32 in HBM, cast hides under the MXU.
    x = x_ref[...].astype(compute_dtype)
    accq[...] += jnp.dot(x, wq_ref[...], preferred_element_type=jnp.float32)
    acck[...] += jnp.dot(x, wk_ref[...], preferred_element_type=jnp.float32)
    accv[...] += jnp.dot(x, wv_ref[...], preferred_element_type=jnp.float32)

    @pl.when(kk == pl.num_programs(1) - 1)
    def _writeback():
        D = head_dim
        cq, sq = cq_ref[...], sq_ref[...]        # (tm, D) f32, sin pre-signed
        ck, sk = ck_ref[...], sk_ref[...]
        # rotate_half(x) == roll(x, D/2) with the sign folded into sin:
        # per-head lane-aligned slices -> XLU roll + VPU muls, off the
        # attention critical path.
        for h in range(num_heads):
            xh = accq[:, h * D:(h + 1) * D]
            q_ref[:, h * D:(h + 1) * D] = (
                xh * cq + pltpu.roll(xh, shift=D // 2, axis=1) * sq
            ).astype(q_ref.dtype)
        for h in range(num_kv_heads):
            xh = acck[:, h * D:(h + 1) * D]
            k_ref[:, h * D:(h + 1) * D] = (
                xh * ck + pltpu.roll(xh, shift=D // 2, axis=1) * sk
            ).astype(k_ref.dtype)
        v_ref[...] = accv[...].astype(v_ref.dtype)


def qkv_proj_rope_pallas(x2d, p, cos_q, sin_q, cos_k, sin_k, *,
                         num_heads, num_kv_heads, head_dim, compute_dtype,
                         tm_target=256, tk_target=512):
    """x2d:(M,K). Returns rotated q:(M,Nq), rotated k:(M,Nk), v:(M,Nk)."""
    M, K = x2d.shape
    Nq = p["wq_t"].shape[1]
    Nk = p["wk_t"].shape[1]
    D = head_dim
    tm = _pick_tile(M, tm_target, 8)
    tk = _pick_tile(K, tk_target, 128)
    grid = (M // tm, K // tk)
    kernel = functools.partial(
        _qkv_proj_rope_kernel, compute_dtype=compute_dtype,
        num_heads=num_heads, num_kv_heads=num_kv_heads, head_dim=D)
    return pl.pallas_call(
        kernel,
        out_shape=(jax.ShapeDtypeStruct((M, Nq), compute_dtype),
                   jax.ShapeDtypeStruct((M, Nk), compute_dtype),
                   jax.ShapeDtypeStruct((M, Nk), compute_dtype)),
        grid=grid,
        in_specs=[
            pl.BlockSpec((tm, tk), lambda m, k: (m, k)),   # x (shared by 3 dots)
            pl.BlockSpec((tk, Nq), lambda m, k: (k, 0)),   # wq^T (pre-scaled 1/sqrt(D))
            pl.BlockSpec((tk, Nk), lambda m, k: (k, 0)),   # wk^T
            pl.BlockSpec((tk, Nk), lambda m, k: (k, 0)),   # wv^T
            pl.BlockSpec((1, Nq), lambda m, k: (0, 0)),    # bq (pre-scaled)
            pl.BlockSpec((1, Nk), lambda m, k: (0, 0)),    # bk
            pl.BlockSpec((1, Nk), lambda m, k: (0, 0)),    # bv
            pl.BlockSpec((tm, D), lambda m, k: (m, 0)),    # cos rows, q positions
            pl.BlockSpec((tm, D), lambda m, k: (m, 0)),    # signed sin, q positions
            pl.BlockSpec((tm, D), lambda m, k: (m, 0)),    # cos rows, k positions
            pl.BlockSpec((tm, D), lambda m, k: (m, 0)),    # signed sin, k positions
        ],
        out_specs=(pl.BlockSpec((tm, Nq), lambda m, k: (m, 0)),
                   pl.BlockSpec((tm, Nk), lambda m, k: (m, 0)),
                   pl.BlockSpec((tm, Nk), lambda m, k: (m, 0))),
        scratch_shapes=[pltpu.VMEM((tm, Nq), jnp.float32),
                        pltpu.VMEM((tm, Nk), jnp.float32),
                        pltpu.VMEM((tm, Nk), jnp.float32)],
        compiler_params=pltpu.CompilerParams(
            dimension_semantics=("parallel", "arbitrary")),
    )(x2d, p["wq_t"], p["wk_t"], p["wv_t"], p["bq"], p["bk"], p["bv"],
      cos_q, sin_q, cos_k, sin_k)


# ---------------------- flash attention (online softmax) ---------------------
def _flash_attn_kernel(q_ref, k_ref, v_ref, o_ref, m_scr, l_scr, acc_scr,
                       *, n_rep, head_dim, sq, skv, use_approx_recip):
    D = head_dim
    qi = pl.program_id(2)
    ki = pl.program_id(3)
    nk = pl.num_programs(3)

    @pl.when(ki == 0)
    def _init():
        m_scr[...] = jnp.full(m_scr.shape, -jnp.inf, dtype=m_scr.dtype)
        l_scr[...] = jnp.zeros(l_scr.shape, dtype=l_scr.dtype)
        acc_scr[...] = jnp.zeros(acc_scr.shape, dtype=acc_scr.dtype)

    q_start = qi * sq
    kv_start = ki * skv

    # Causal: skip KV tiles that lie entirely in the future of this Q tile.
    @pl.when(kv_start <= q_start + sq - 1)
    def _compute():
        k = k_ref[0]                      # (skv, D), shared by the rep group
        v = v_ref[0]                      # (skv, D)
        qall = q_ref[0]                   # (sq, n_rep*D)
        row = q_start + jax.lax.broadcasted_iota(jnp.int32, (sq, skv), 0)
        col = kv_start + jax.lax.broadcasted_iota(jnp.int32, (sq, skv), 1)
        causal = col <= row               # in-register mask, no HBM traffic
        for r in range(n_rep):
            qh = qall[:, r * D:(r + 1) * D]               # (sq, D)
            s = jax.lax.dot_general(qh, k, (((1,), (1,)), ((), ())),
                                    preferred_element_type=jnp.float32)
            s = jnp.where(causal, s, -1e30)
            m_prev = m_scr[r]                             # (sq, 1)
            m_new = jnp.maximum(m_prev, jnp.max(s, axis=-1, keepdims=True))
            alpha = jnp.exp(m_prev - m_new)
            p = jnp.exp(s - m_new)
            l_scr[r] = alpha * l_scr[r] + jnp.sum(p, axis=-1, keepdims=True)
            pv = jnp.dot(p.astype(v.dtype), v,
                         preferred_element_type=jnp.float32)
            acc_scr[:, r * D:(r + 1) * D] = (
                alpha * acc_scr[:, r * D:(r + 1) * D] + pv)
            m_scr[r] = m_new

    @pl.when(ki == nk - 1)
    def _finalize():
        for r in range(n_rep):
            l = l_scr[r]
            if use_approx_recip:
                inv = pl.reciprocal(l, approx=True)       # EUP slot (bf16 path)
            else:
                inv = 1.0 / l                             # exact (f32 path)
            o_ref[0, :, r * D:(r + 1) * D] = (
                acc_scr[:, r * D:(r + 1) * D] * inv).astype(o_ref.dtype)


def flash_attention_pallas(q, k, v, *, num_kv_heads, n_rep, head_dim,
                           sq, skv, compute_dtype):
    """q:(B,S,NH*D), k/v:(B,S,NKV*D) -> (B,S,NH*D) (heads already RoPE'd)."""
    B, S, _ = q.shape
    D = head_dim
    NKV = num_kv_heads
    grid = (B, NKV, S // sq, S // skv)
    use_approx = jnp.dtype(compute_dtype) == jnp.dtype(jnp.bfloat16)
    kernel = functools.partial(
        _flash_attn_kernel, n_rep=n_rep, head_dim=D, sq=sq, skv=skv,
        use_approx_recip=use_approx)
    return pl.pallas_call(
        kernel,
        out_shape=jax.ShapeDtypeStruct((B, S, NKV * n_rep * D), compute_dtype),
        grid=grid,
        in_specs=[
            # Q block = whole rep group -> lane-dense (n_rep*D) slabs
            pl.BlockSpec((1, sq, n_rep * D), lambda b, g, i, j: (b, i, g)),
            pl.BlockSpec((1, skv, D), lambda b, g, i, j: (b, j, g)),
            pl.BlockSpec((1, skv, D), lambda b, g, i, j: (b, j, g)),
        ],
        out_specs=pl.BlockSpec((1, sq, n_rep * D), lambda b, g, i, j: (b, i, g)),
        scratch_shapes=[pltpu.VMEM((n_rep, sq, 1), jnp.float32),   # running max
                        pltpu.VMEM((n_rep, sq, 1), jnp.float32),   # running sum
                        pltpu.VMEM((sq, n_rep * D), jnp.float32)], # accumulator
        compiler_params=pltpu.CompilerParams(
            dimension_semantics=("parallel", "parallel", "parallel", "arbitrary")),
    )(q, k, v)


# --------------------------- generic tiled linear ----------------------------
def _linear_kernel(x_ref, w_ref, o_ref, acc_ref, *, compute_dtype):
    kk = pl.program_id(2)

    @pl.when(kk == 0)
    def _():
        acc_ref[...] = jnp.zeros(acc_ref.shape, dtype=acc_ref.dtype)

    acc_ref[...] += jnp.dot(x_ref[...].astype(compute_dtype), w_ref[...],
                            preferred_element_type=jnp.float32)

    @pl.when(kk == pl.num_programs(2) - 1)
    def _():
        o_ref[...] = acc_ref[...].astype(o_ref.dtype)


def linear_pallas(x2d, w_t, *, out_dtype, compute_dtype,
                  tm_target=256, tn_target=512, tk_target=512):
    """x2d:(M,K) @ w_t:(K,N) -> (M,N), no bias."""
    M, K = x2d.shape
    N = w_t.shape[1]
    tm = _pick_tile(M, tm_target, 8)
    tn = _pick_tile(N, tn_target, 128)
    tk = _pick_tile(K, tk_target, 128)
    grid = (M // tm, N // tn, K // tk)
    return pl.pallas_call(
        functools.partial(_linear_kernel, compute_dtype=compute_dtype),
        out_shape=jax.ShapeDtypeStruct((M, N), out_dtype),
        grid=grid,
        in_specs=[pl.BlockSpec((tm, tk), lambda m, n, k: (m, k)),
                  pl.BlockSpec((tk, tn), lambda m, n, k: (k, n))],
        out_specs=pl.BlockSpec((tm, tn), lambda m, n, k: (m, n)),
        scratch_shapes=[pltpu.VMEM((tm, tn), jnp.float32)],
        compiler_params=pltpu.CompilerParams(
            dimension_semantics=("parallel", "parallel", "arbitrary")),
    )(x2d, w_t)


# ---------------------------- weight preparation -----------------------------
def prepare_params(raw, num_heads, compute_dtype):
    """Pre-transpose weights, fold 1/sqrt(head_dim) into q_proj, cast once."""
    D = raw["wq"].shape[0] // num_heads
    scale = 1.0 / math.sqrt(D)
    return {
        "wq_t": (raw["wq"].T * scale).astype(compute_dtype),
        "bq": (raw["bq"] * scale).astype(jnp.float32).reshape(1, -1),
        "wk_t": raw["wk"].T.astype(compute_dtype),
        "bk": raw["bk"].astype(jnp.float32).reshape(1, -1),
        "wv_t": raw["wv"].T.astype(compute_dtype),
        "bv": raw["bv"].astype(jnp.float32).reshape(1, -1),
        "wo_t": raw["wo"].T.astype(compute_dtype),
    }


# ------------------------------ full forward ---------------------------------
def qwen2_attention_forward(hidden_states, position_ids, prepared,
                            num_heads, num_kv_heads, rope_theta,
                            compute_dtype=jnp.bfloat16,
                            sq_target=256, skv_target=512,
                            tm_target=256, tk_target=512, tn_target=512):
    B, S, H = hidden_states.shape
    NH, NKV = num_heads, num_kv_heads
    D = H // NH
    n_rep = NH // NKV
    assert D % 128 == 0, "head_dim must be a multiple of 128 for this layout"
    assert S % 8 == 0, "seq_len must be a multiple of 8"
    M = B * S

    # ---- rotary tables (f32 glue, built once per call) ----
    # rotate_half(x) == roll(x, D/2) with the sign folded into sin.
    inv_freq = 1.0 / (rope_theta ** (jnp.arange(0, D, 2, dtype=jnp.float32) / D))
    t = jnp.arange(S, dtype=jnp.float32)
    freqs = jnp.outer(t, inv_freq)
    emb = jnp.concatenate([freqs, freqs], axis=-1)              # (S, D)
    cos = jnp.cos(emb)
    sign = jnp.concatenate([-jnp.ones((D // 2,), jnp.float32),
                            jnp.ones((D // 2,), jnp.float32)])
    sin_signed = jnp.sin(emb) * sign
    # per-row tables: query rows use per-batch position_ids, key rows use arange
    cos_q_rows = cos[position_ids].reshape(M, D)
    sin_q_rows = sin_signed[position_ids].reshape(M, D)
    cos_k_rows = jnp.broadcast_to(cos[None], (B, S, D)).reshape(M, D)
    sin_k_rows = jnp.broadcast_to(sin_signed[None], (B, S, D)).reshape(M, D)

    # ---- fused q/k/v projection + RoPE at writeback ----
    x2d = hidden_states.reshape(M, H)
    q2d, k2d, v2d = qkv_proj_rope_pallas(
        x2d, prepared, cos_q_rows, sin_q_rows, cos_k_rows, sin_k_rows,
        num_heads=NH, num_kv_heads=NKV, head_dim=D, compute_dtype=compute_dtype,
        tm_target=tm_target, tk_target=tk_target)

    # free (metadata-only) reshapes; no transposes
    qv = q2d.reshape(B, S, NH * D)
    kv = k2d.reshape(B, S, NKV * D)
    vv = v2d.reshape(B, S, NKV * D)

    # ---- flash attention (causal, GQA folded into kernel body) ----
    sq = _pick_tile(S, sq_target, 8)
    skv = _pick_tile(S, skv_target, 8)
    attn = flash_attention_pallas(qv, kv, vv, num_kv_heads=NKV, n_rep=n_rep,
                                  head_dim=D, sq=sq, skv=skv,
                                  compute_dtype=compute_dtype)

    # ---- output projection (no bias) ----
    out = linear_pallas(attn.reshape(M, NH * D), prepared["wo_t"],
                        out_dtype=hidden_states.dtype, compute_dtype=compute_dtype,
                        tm_target=tm_target, tn_target=tn_target,
                        tk_target=tk_target)
    return out.reshape(B, S, H)


# ------------------------------ pure-JAX reference ---------------------------
def _reference(hidden_states, attention_mask, position_ids, raw,
               num_heads, num_kv_heads, rope_theta):
    B, S, H = hidden_states.shape
    NH, NKV = num_heads, num_kv_heads
    D = H // NH
    n_rep = NH // NKV

    q = hidden_states @ raw["wq"].T + raw["bq"]
    k = hidden_states @ raw["wk"].T + raw["bk"]
    v = hidden_states @ raw["wv"].T + raw["bv"]
    q = q.reshape(B, S, NH, D).transpose(0, 2, 1, 3)
    k = k.reshape(B, S, NKV, D).transpose(0, 2, 1, 3)
    v = v.reshape(B, S, NKV, D).transpose(0, 2, 1, 3)

    inv_freq = 1.0 / (rope_theta ** (jnp.arange(0, D, 2, dtype=jnp.float32) / D))
    freqs = jnp.outer(jnp.arange(S, dtype=jnp.float32), inv_freq)
    emb = jnp.concatenate([freqs, freqs], axis=-1)
    cos, sin = jnp.cos(emb), jnp.sin(emb)

    def rot_half(x):
        x1, x2 = x[..., :D // 2], x[..., D // 2:]
        return jnp.concatenate([-x2, x1], axis=-1)

    def rope(x, pos):
        c = cos[pos][:, None, :, :]
        s = sin[pos][:, None, :, :]
        return x * c + rot_half(x) * s

    q = rope(q, position_ids)
    k = rope(k, jnp.arange(S)[None, :])

    k = jnp.repeat(k, n_rep, axis=1)
    v = jnp.repeat(v, n_rep, axis=1)

    scores = jnp.einsum("bhqd,bhkd->bhqk", q, k) / math.sqrt(D)
    scores = scores + attention_mask
    w = jax.nn.softmax(scores.astype(jnp.float32), axis=-1)
    o = jnp.einsum("bhqk,bhkd->bhqd", w, v)
    o = o.transpose(0, 2, 1, 3).reshape(B, S, H)
    return o @ raw["wo"].T


# ----------------------------------- main ------------------------------------
if __name__ == "__main__":
    # Small Qwen2-like config (head_dim=128 like real Qwen2)
    batch = 2
    seq = 8
    num_heads = 4
    num_kv_heads = 2
    head_dim = 128
    hidden = num_heads * head_dim        # 512
    rope_theta = 10000.0

    key = jax.random.PRNGKey(0)
    ks = jax.random.split(key, 8)
    s = 0.02
    raw = {
        "wq": s * jax.random.normal(ks[0], (num_heads * head_dim, hidden), jnp.float32),
        "bq": s * jax.random.normal(ks[1], (num_heads * head_dim,), jnp.float32),
        "wk": s * jax.random.normal(ks[2], (num_kv_heads * head_dim, hidden), jnp.float32),
        "bk": s * jax.random.normal(ks[3], (num_kv_heads * head_dim,), jnp.float32),
        "wv": s * jax.random.normal(ks[4], (num_kv_heads * head_dim, hidden), jnp.float32),
        "bv": s * jax.random.normal(ks[5], (num_kv_heads * head_dim,), jnp.float32),
        "wo": s * jax.random.normal(ks[6], (hidden, num_heads * head_dim), jnp.float32),
    }
    hidden_states = jax.random.normal(ks[7], (batch, seq, hidden), jnp.float32)
    position_ids = jnp.broadcast_to(jnp.arange(seq), (batch, seq))

    # Reference (equivalent causal additive mask), evaluated at full f32
    # matmul precision so it does not suffer TPU DEFAULT bf16 demotion.
    causal = jnp.tril(jnp.ones((seq, seq), jnp.bool_))
    add_mask = jnp.where(causal, 0.0, -1e9).astype(jnp.float32)
    add_mask = jnp.broadcast_to(add_mask[None, None], (batch, 1, seq, seq))
    with jax.default_matmul_precision("highest"):
        ref = _reference(hidden_states, add_mask, position_ids, raw,
                         num_heads, num_kv_heads, rope_theta)
    ref = jax.block_until_ready(ref)
    ref_scale = float(jnp.max(jnp.abs(ref)))

    # f32 compute path
    pp32 = prepare_params(raw, num_heads, jnp.float32)
    out32 = qwen2_attention_forward(hidden_states, position_ids, pp32,
                                    num_heads, num_kv_heads, rope_theta,
                                    compute_dtype=jnp.float32)
    out32 = jax.block_until_ready(out32)
    assert out32.shape == (batch, seq, hidden)
    err32 = float(jnp.max(jnp.abs(out32 - ref)))
    assert err32 <= 2e-3 + 2e-2 * ref_scale, \
        f"f32 mismatch vs reference: max abs err {err32:.3e} (scale {ref_scale:.3e})"

    # bf16 compute path (MXU-friendly; looser tolerance)
    pp16 = prepare_params(raw, num_heads, jnp.bfloat16)
    out16 = qwen2_attention_forward(hidden_states, position_ids, pp16,
                                    num_heads, num_kv_heads, rope_theta,
                                    compute_dtype=jnp.bfloat16)
    out16 = jax.block_until_ready(out16)
    err16 = float(jnp.max(jnp.abs(out16.astype(jnp.float32) - ref)))
    assert err16 <= 1e-2 + 1e-1 * ref_scale, \
        f"bf16 mismatch vs reference: max abs err {err16:.3e} (scale {ref_scale:.3e})"

    print("KERNEL_OK")
</pallas_src>

<mosaic_0001>
module attributes {stable_mosaic.version = 11 : i64} {
  func.func @_qkv_proj_rope_kernel(%arg0: i32, %arg1: i32, %arg2: memref<16x512xf32, #tpu.memory_space<vmem>>, %arg3: memref<512x512xf32, #tpu.memory_space<vmem>>, %arg4: memref<512x256xf32, #tpu.memory_space<vmem>>, %arg5: memref<512x256xf32, #tpu.memory_space<vmem>>, %arg6: memref<1x512xf32, #tpu.memory_space<vmem>>, %arg7: memref<1x256xf32, #tpu.memory_space<vmem>>, %arg8: memref<1x256xf32, #tpu.memory_space<vmem>>, %arg9: memref<16x128xf32, #tpu.memory_space<vmem>>, %arg10: memref<16x128xf32, #tpu.memory_space<vmem>>, %arg11: memref<16x128xf32, #tpu.memory_space<vmem>>, %arg12: memref<16x128xf32, #tpu.memory_space<vmem>>, %arg13: memref<16x512xf32, #tpu.memory_space<vmem>>, %arg14: memref<16x256xf32, #tpu.memory_space<vmem>>, %arg15: memref<16x256xf32, #tpu.memory_space<vmem>>, %arg16: memref<16x512xf32, #tpu.memory_space<vmem>>, %arg17: memref<16x256xf32, #tpu.memory_space<vmem>>, %arg18: memref<16x256xf32, #tpu.memory_space<vmem>>) attributes {dimension_semantics = [#tpu.dimension_semantics<parallel>, #tpu.dimension_semantics<arbitrary>], iteration_bounds = array<i64: 1, 1>, scalar_prefetch = 0 : i64, scratch_operands = 3 : i64, tpu.core_type = #tpu.core_type<tc>, window_params = [{transform_indices = @transform_0, window_bounds = array<i64: 16, 512>}, {transform_indices = @transform_1, window_bounds = array<i64: 512, 512>}, {transform_indices = @transform_2, window_bounds = array<i64: 512, 256>}, {transform_indices = @transform_3, window_bounds = array<i64: 512, 256>}, {pipeline_mode = #tpu.pipeline_mode<synchronous>, transform_indices = @transform_4, window_bounds = array<i64: 1, 512>}, {pipeline_mode = #tpu.pipeline_mode<synchronous>, transform_indices = @transform_5, window_bounds = array<i64: 1, 256>}, {pipeline_mode = #tpu.pipeline_mode<synchronous>, transform_indices = @transform_6, window_bounds = array<i64: 1, 256>}, {transform_indices = @transform_7, window_bounds = array<i64: 16, 128>}, {transform_indices = @transform_8, window_bounds = array<i64: 16, 128>}, {transform_indices = @transform_9, window_bounds = array<i64: 16, 128>}, {transform_indices = @transform_10, window_bounds = array<i64: 16, 128>}, {transform_indices = @transform_11, window_bounds = array<i64: 16, 512>}, {transform_indices = @transform_12, window_bounds = array<i64: 16, 256>}, {transform_indices = @transform_13, window_bounds = array<i64: 16, 256>}]} {
    %c0_i32 = arith.constant 0 : i32
    %0 = arith.cmpi eq, %arg1, %c0_i32 : i32
    %1 = arith.extui %0 : i1 to i32
    %c0_i32_0 = arith.constant 0 : i32
    %2 = arith.cmpi ne, %1, %c0_i32_0 : i32
    scf.if %2 {
      %c0_24 = arith.constant 0 : index
      %c0_25 = arith.constant 0 : index
      %22 = vector.load %arg6[%c0_24, %c0_25] : memref<1x512xf32, #tpu.memory_space<vmem>>, vector<1x512xf32>
      %23 = vector.shape_cast %22 : vector<1x512xf32> to vector<1x512xf32>
      %24 = vector.broadcast %23 : vector<1x512xf32> to vector<16x512xf32>
      %c0_26 = arith.constant 0 : index
      %c0_27 = arith.constant 0 : index
      %25 = vector.load %arg16[%c0_26, %c0_27] : memref<16x512xf32, #tpu.memory_space<vmem>>, vector<16x512xf32>
      tpu.vector_store %arg16[%c0_26, %c0_27], %24 {strides = array<i32>} : memref<16x512xf32, #tpu.memory_space<vmem>>, vector<16x512xf32>,
      %c0_28 = arith.constant 0 : index
      %c0_29 = arith.constant 0 : index
      %26 = vector.load %arg7[%c0_28, %c0_29] : memref<1x256xf32, #tpu.memory_space<vmem>>, vector<1x256xf32>
      %27 = vector.shape_cast %26 : vector<1x256xf32> to vector<1x256xf32>
      %28 = vector.broadcast %27 : vector<1x256xf32> to vector<16x256xf32>
      %c0_30 = arith.constant 0 : index
      %c0_31 = arith.constant 0 : index
      %29 = vector.load %arg17[%c0_30, %c0_31] : memref<16x256xf32, #tpu.memory_space<vmem>>, vector<16x256xf32>
      tpu.vector_store %arg17[%c0_30, %c0_31], %28 {strides = array<i32>} : memref<16x256xf32, #tpu.memory_space<vmem>>, vector<16x256xf32>,
      %c0_32 = arith.constant 0 : index
      %c0_33 = arith.constant 0 : index
      %30 = vector.load %arg8[%c0_32, %c0_33] : memref<1x256xf32, #tpu.memory_space<vmem>>, vector<1x256xf32>
      %31 = vector.shape_cast %30 : vector<1x256xf32> to vector<1x256xf32>
      %32 = vector.broadcast %31 : vector<1x256xf32> to vector<16x256xf32>
      %c0_34 = arith.constant 0 : index
      %c0_35 = arith.constant 0 : index
      %33 = vector.load %arg18[%c0_34, %c0_35] : memref<16x256xf32, #tpu.memory_space<vmem>>, vector<16x256xf32>
      tpu.vector_store %arg18[%c0_34, %c0_35], %32 {strides = array<i32>} : memref<16x256xf32, #tpu.memory_space<vmem>>, vector<16x256xf32>,
    } else {
    }
    %c0 = arith.constant 0 : index
    %c0_1 = arith.constant 0 : index
    %3 = vector.load %arg2[%c0, %c0_1] : memref<16x512xf32, #tpu.memory_space<vmem>>, vector<16x512xf32>
    %c0_2 = arith.constant 0 : index
    %c0_3 = arith.constant 0 : index
    %4 = vector.load %arg16[%c0_2, %c0_3] : memref<16x512xf32, #tpu.memory_space<vmem>>, vector<16x512xf32>
    %c0_4 = arith.constant 0 : index
    %c0_5 = arith.constant 0 : index
    %5 = vector.load %arg3[%c0_4, %c0_5] : memref<512x512xf32, #tpu.memory_space<vmem>>, vector<512x512xf32>
    %cst = arith.constant dense<0.000000e+00> : vector<16x512xf32>
    %6 = tpu.matmul %3, %5, %cst {dimension_numbers = #tpu.dot_dimension_numbers<[1], [0], [0], [1], [0, 0, 1, 1], [], []>} : vector<16x512xf32>, vector<512x512xf32>, vector<16x512xf32> -> vector<16x512xf32>
    %7 = arith.addf %4, %6 : vector<16x512xf32>
    %c0_6 = arith.constant 0 : index
    %c0_7 = arith.constant 0 : index
    %8 = vector.load %arg16[%c0_6, %c0_7] : memref<16x512xf32, #tpu.memory_space<vmem>>, vector<16x512xf32>
    tpu.vector_store %arg16[%c0_6, %c0_7], %7 {strides = array<i32>} : memref<16x512xf32, #tpu.memory_space<vmem>>, vector<16x512xf32>,
    %c0_8 = arith.constant 0 : index
    %c0_9 = arith.constant 0 : index
    %9 = vector.load %arg17[%c0_8, %c0_9] : memref<16x256xf32, #tpu.memory_space<vmem>>, vector<16x256xf32>
    %c0_10 = arith.constant 0 : index
    %c0_11 = arith.constant 0 : index
    %10 = vector.load %arg4[%c0_10, %c0_11] : memref<512x256xf32, #tpu.memory_space<vmem>>, vector<512x256xf32>
    %cst_12 = arith.constant dense<0.000000e+00> : vector<16x256xf32>
    %11 = tpu.matmul %3, %10, %cst_12 {dimension_numbers = #tpu.dot_dimension_numbers<[1], [0], [0], [1], [0, 0, 1, 1], [], []>} : vector<16x512xf32>, vector<512x256xf32>, vector<16x256xf32> -> vector<16x256xf32>
    %12 = arith.addf %9, %11 : vector<16x256xf32>
    %c0_13 = arith.constant 0 : index
    %c0_14 = arith.constant 0 : index
    %13 = vector.load %arg17[%c0_13, %c0_14] : memref<16x256xf32, #tpu.memory_space<vmem>>, vector<16x256xf32>
    tpu.vector_store %arg17[%c0_13, %c0_14], %12 {strides = array<i32>} : memref<16x256xf32, #tpu.memory_space<vmem>>, vector<16x256xf32>,
    %c0_15 = arith.constant 0 : index
    %c0_16 = arith.constant 0 : index
    %14 = vector.load %arg18[%c0_15, %c0_16] : memref<16x256xf32, #tpu.memory_space<vmem>>, vector<16x256xf32>
    %c0_17 = arith.constant 0 : index
    %c0_18 = arith.constant 0 : index
    %15 = vector.load %arg5[%c0_17, %c0_18] : memref<512x256xf32, #tpu.memory_space<vmem>>, vector<512x256xf32>
    %cst_19 = arith.constant dense<0.000000e+00> : vector<16x256xf32>
    %16 = tpu.matmul %3, %15, %cst_19 {dimension_numbers = #tpu.dot_dimension_numbers<[1], [0], [0], [1], [0, 0, 1, 1], [], []>} : vector<16x512xf32>, vector<512x256xf32>, vector<16x256xf32> -> vector<16x256xf32>
    %17 = arith.addf %14, %16 : vector<16x256xf32>
    %c0_20 = arith.constant 0 : index
    %c0_21 = arith.constant 0 : index
    %18 = vector.load %arg18[%c0_20, %c0_21] : memref<16x256xf32, #tpu.memory_space<vmem>>, vector<16x256xf32>
    tpu.vector_store %arg18[%c0_20, %c0_21], %17 {strides = array<i32>} : memref<16x256xf32, #tpu.memory_space<vmem>>, vector<16x256xf32>,
    %c0_i32_22 = arith.constant 0 : i32
    %19 = arith.cmpi eq, %arg1, %c0_i32_22 : i32
    %20 = arith.extui %19 : i1 to i32
    %c0_i32_23 = arith.constant 0 : i32
    %21 = arith.cmpi ne, %20, %c0_i32_23 : i32
    scf.if %21 {
      %c0_24 = arith.constant 0 : index
      %c0_25 = arith.constant 0 : index
      %22 = vector.load %arg9[%c0_24, %c0_25] : memref<16x128xf32, #tpu.memory_space<vmem>>, vector<16x128xf32>
      %c0_26 = arith.constant 0 : index
      %c0_27 = arith.constant 0 : index
      %23 = vector.load %arg10[%c0_26, %c0_27] : memref<16x128xf32, #tpu.memory_space<vmem>>, vector<16x128xf32>
      %c0_28 = arith.constant 0 : index
      %c0_29 = arith.constant 0 : index
      %24 = vector.load %arg11[%c0_28, %c0_29] : memref<16x128xf32, #tpu.memory_space<vmem>>, vector<16x128xf32>
      %c0_30 = arith.constant 0 : index
      %c0_31 = arith.constant 0 : index
      %25 = vector.load %arg12[%c0_30, %c0_31] : memref<16x128xf32, #tpu.memory_space<vmem>>, vector<16x128xf32>
      %c0_32 = arith.constant 0 : index
      %c0_33 = arith.constant 0 : index
      %26 = vector.load %arg16[%c0_32, %c0_33] : memref<16x512xf32, #tpu.memory_space<vmem>>, vector<16x128xf32>
      %27 = arith.mulf %26, %22 : vector<16x128xf32>
      %c64_i32 = arith.constant 64 : i32
      %28 = tpu.dynamic_rotate %26 by %c64_i32 dim 1 : vector<16x128xf32>, i32 -> vector<16x128xf32>
      %29 = arith.mulf %28, %23 : vector<16x128xf32>
      %30 = arith.addf %27, %29 : vector<16x128xf32>
      %c0_34 = arith.constant 0 : index
      %c0_35 = arith.constant 0 : index
      %31 = vector.load %arg13[%c0_34, %c0_35] : memref<16x512xf32, #tpu.memory_space<vmem>>, vector<16x128xf32>
      tpu.vector_store %arg13[%c0_34, %c0_35], %30 {strides = array<i32>} : memref<16x512xf32, #tpu.memory_space<vmem>>, vector<16x128xf32>,
      %c0_36 = arith.constant 0 : index
      %c128 = arith.constant 128 : index
      %32 = vector.load %arg16[%c0_36, %c128] : memref<16x512xf32, #tpu.memory_space<vmem>>, vector<16x128xf32>
      %33 = arith.mulf %32, %22 : vector<16x128xf32>
      %c64_i32_37 = arith.constant 64 : i32
      %34 = tpu.dynamic_rotate %32 by %c64_i32_37 dim 1 : vector<16x128xf32>, i32 -> vector<16x128xf32>
      %35 = arith.mulf %34, %23 : vector<16x128xf32>
      %36 = arith.addf %33, %35 : vector<16x128xf32>
      %c0_38 = arith.constant 0 : index
      %c128_39 = arith.constant 128 : index
      %37 = vector.load %arg13[%c0_38, %c128_39] : memref<16x512xf32, #tpu.memory_space<vmem>>, vector<16x128xf32>
      tpu.vector_store %arg13[%c0_38, %c128_39], %36 {strides = array<i32>} : memref<16x512xf32, #tpu.memory_space<vmem>>, vector<16x128xf32>,
      %c0_40 = arith.constant 0 : index
      %c256 = arith.constant 256 : index
      %38 = vector.load %arg16[%c0_40, %c256] : memref<16x512xf32, #tpu.memory_space<vmem>>, vector<16x128xf32>
      %39 = arith.mulf %38, %22 : vector<16x128xf32>
      %c64_i32_41 = arith.constant 64 : i32
      %40 = tpu.dynamic_rotate %38 by %c64_i32_41 dim 1 : vector<16x128xf32>, i32 -> vector<16x128xf32>
      %41 = arith.mulf %40, %23 : vector<16x128xf32>
      %42 = arith.addf %39, %41 : vector<16x128xf32>
      %c0_42 = arith.constant 0 : index
      %c256_43 = arith.constant 256 : index
      %43 = vector.load %arg13[%c0_42, %c256_43] : memref<16x512xf32, #tpu.memory_space<vmem>>, vector<16x128xf32>
      tpu.vector_store %arg13[%c0_42, %c256_43], %42 {strides = array<i32>} : memref<16x512xf32, #tpu.memory_space<vmem>>, vector<16x128xf32>,
      %c0_44 = arith.constant 0 : index
      %c384 = arith.constant 384 : index
      %44 = vector.load %arg16[%c0_44, %c384] : memref<16x512xf32, #tpu.memory_space<vmem>>, vector<16x128xf32>
      %45 = arith.mulf %44, %22 : vector<16x128xf32>
      %c64_i32_45 = arith.constant 64 : i32
      %46 = tpu.dynamic_rotate %44 by %c64_i32_45 dim 1 : vector<16x128xf32>, i32 -> vector<16x128xf32>
      %47 = arith.mulf %46, %23 : vector<16x128xf32>
      %48 = arith.addf %45, %47 : vector<16x128xf32>
      %c0_46 = arith.constant 0 : index
      %c384_47 = arith.constant 384 : index
      %49 = vector.load %arg13[%c0_46, %c384_47] : memref<16x512xf32, #tpu.memory_space<vmem>>, vector<16x128xf32>
      tpu.vector_store %arg13[%c0_46, %c384_47], %48 {strides = array<i32>} : memref<16x512xf32, #tpu.memory_space<vmem>>, vector<16x128xf32>,
      %c0_48 = arith.constant 0 : index
      %c0_49 = arith.constant 0 : index
      %50 = vector.load %arg17[%c0_48, %c0_49] : memref<16x256xf32, #tpu.memory_space<vmem>>, vector<16x128xf32>
      %51 = arith.mulf %50, %24 : vector<16x128xf32>
      %c64_i32_50 = arith.constant 64 : i32
      %52 = tpu.dynamic_rotate %50 by %c64_i32_50 dim 1 : vector<16x128xf32>, i32 -> vector<16x128xf32>
      %53 = arith.mulf %52, %25 : vector<16x128xf32>
      %54 = arith.addf %51, %53 : vector<16x128xf32>
      %c0_51 = arith.constant 0 : index
      %c0_52 = arith.constant 0 : index
      %55 = vector.load %arg14[%c0_51, %c0_52] : memref<16x256xf32, #tpu.memory_space<vmem>>, vector<16x128xf32>
      tpu.vector_store %arg14[%c0_51, %c0_52], %54 {strides = array<i32>} : memref<16x256xf32, #tpu.memory_space<vmem>>, vector<16x128xf32>,
      %c0_53 = arith.constant 0 : index
      %c128_54 = arith.constant 128 : index
      %56 = vector.load %arg17[%c0_53, %c128_54] : memref<16x256xf32, #tpu.memory_space<vmem>>, vector<16x128xf32>
      %57 = arith.mulf %56, %24 : vector<16x128xf32>
      %c64_i32_55 = arith.constant 64 : i32
      %58 = tpu.dynamic_rotate %56 by %c64_i32_55 dim 1 : vector<16x128xf32>, i32 -> vector<16x128xf32>
      %59 = arith.mulf %58, %25 : vector<16x128xf32>
      %60 = arith.addf %57, %59 : vector<16x128xf32>
      %c0_56 = arith.constant 0 : index
      %c128_57 = arith.constant 128 : index
      %61 = vector.load %arg14[%c0_56, %c128_57] : memref<16x256xf32, #tpu.memory_space<vmem>>, vector<16x128xf32>
      tpu.vector_store %arg14[%c0_56, %c128_57], %60 {strides = array<i32>} : memref<16x256xf32, #tpu.memory_space<vmem>>, vector<16x128xf32>,
      %c0_58 = arith.constant 0 : index
      %c0_59 = arith.constant 0 : index
      %62 = vector.load %arg18[%c0_58, %c0_59] : memref<16x256xf32, #tpu.memory_space<vmem>>, vector<16x256xf32>
      %c0_60 = arith.constant 0 : index
      %c0_61 = arith.constant 0 : index
      %63 = vector.load %arg15[%c0_60, %c0_61] : memref<16x256xf32, #tpu.memory_space<vmem>>, vector<16x256xf32>
      tpu.vector_store %arg15[%c0_60, %c0_61], %62 {strides = array<i32>} : memref<16x256xf32, #tpu.memory_space<vmem>>, vector<16x256xf32>,
    } else {
    }
    return
  }
  func.func @transform_0(%arg0: i32, %arg1: i32) -> (i32, i32) {
    %c0_i32 = arith.constant 0 : i32
    return %arg0, %arg1 : i32, i32
  }
  func.func @transform_1(%arg0: i32, %arg1: i32) -> (i32, i32) {
    %c0_i32 = arith.constant 0 : i32
    %c0_i32_0 = arith.constant 0 : i32
    return %arg1, %c0_i32 : i32, i32
  }
  func.func @transform_2(%arg0: i32, %arg1: i32) -> (i32, i32) {
    %c0_i32 = arith.constant 0 : i32
    %c0_i32_0 = arith.constant 0 : i32
    return %arg1, %c0_i32 : i32, i32
  }
  func.func @transform_3(%arg0: i32, %arg1: i32) -> (i32, i32) {
    %c0_i32 = arith.constant 0 : i32
    %c0_i32_0 = arith.constant 0 : i32
    return %arg1, %c0_i32 : i32, i32
  }
  func.func @transform_4(%arg0: i32, %arg1: i32) -> (i32, i32) {
    %c0_i32 = arith.constant 0 : i32
    %c0_i32_0 = arith.constant 0 : i32
    %c0_i32_1 = arith.constant 0 : i32
    return %c0_i32, %c0_i32_0 : i32, i32
  }
  func.func @transform_5(%arg0: i32, %arg1: i32) -> (i32, i32) {
    %c0_i32 = arith.constant 0 : i32
    %c0_i32_0 = arith.constant 0 : i32
    %c0_i32_1 = arith.constant 0 : i32
    return %c0_i32, %c0_i32_0 : i32, i32
  }
  func.func @transform_6(%arg0: i32, %arg1: i32) -> (i32, i32) {
    %c0_i32 = arith.constant 0 : i32
    %c0_i32_0 = arith.constant 0 : i32
    %c0_i32_1 = arith.constant 0 : i32
    return %c0_i32, %c0_i32_0 : i32, i32
  }
  func.func @transform_7(%arg0: i32, %arg1: i32) -> (i32, i32) {
    %c0_i32 = arith.constant 0 : i32
    %c0_i32_0 = arith.constant 0 : i32
    return %arg0, %c0_i32 : i32, i32
  }
  func.func @transform_8(%arg0: i32, %arg1: i32) -> (i32, i32) {
    %c0_i32 = arith.constant 0 : i32
    %c0_i32_0 = arith.constant 0 : i32
    return %arg0, %c0_i32 : i32, i32
  }
  func.func @transform_9(%arg0: i32, %arg1: i32) -> (i32, i32) {
    %c0_i32 = arith.constant 0 : i32
    %c0_i32_0 = arith.constant 0 : i32
    return %arg0, %c0_i32 : i32, i32
  }
  func.func @transform_10(%arg0: i32, %arg1: i32) -> (i32, i32) {
    %c0_i32 = arith.constant 0 : i32
    %c0_i32_0 = arith.constant 0 : i32
    return %arg0, %c0_i32 : i32, i32
  }
  func.func @transform_11(%arg0: i32, %arg1: i32) -> (i32, i32) {
    %c0_i32 = arith.constant 0 : i32
    %c0_i32_0 = arith.constant 0 : i32
    return %arg0, %c0_i32 : i32, i32
  }
  func.func @transform_12(%arg0: i32, %arg1: i32) -> (i32, i32) {
    %c0_i32 = arith.constant 0 : i32
    %c0_i32_0 = arith.constant 0 : i32
    return %arg0, %c0_i32 : i32, i32
  }
  func.func @transform_13(%arg0: i32, %arg1: i32) -> (i32, i32) {
    %c0_i32 = arith.constant 0 : i32
    %c0_i32_0 = arith.constant 0 : i32
    return %arg0, %c0_i32 : i32, i32
  }
}

</mosaic_0001>

<bundles_post_ra>
// kernel: tpu_custom_call.1
= control target key start
LH: loop header
LB: loop body
LE: loop exit
PB: predicated region body
PF: predicated region fallthrough
CT: control target
= control target key end

     0   :  { %19 = vsyncpa [#allocation6], 0  ;;  %s2702_s0 = inlined_call_operand.hbm [shape: f32[16,512], index: 0, kind: input, shape index: {}]   ;;  %s2703_s1 = inlined_call_operand.hbm [shape: f32[512,512], index: 1, kind: input, shape index: {}]   ;;  %s2704_s2 = inlined_call_operand.hbm [shape: f32[512,256], index: 2, kind: input, shape index: {}]   ;;  %s2705_s3 = inlined_call_operand.hbm [shape: f32[512,256], index: 3, kind: input, shape index: {}]   ;;  %s2706_s4 = inlined_call_operand.hbm [shape: f32[1,512], index: 4, kind: input, shape index: {}]   ;;  %s2707_s5 = inlined_call_operand.vmem [shape: f32[1,256], index: 5, kind: input, shape index: {}]   ;;  %s2708_s6 = inlined_call_operand.hbm [shape: f32[1,256], index: 6, kind: input, shape index: {}]   ;;  %s2709_s7 = inlined_call_operand.vmem [shape: f32[16,128], index: 7, kind: input, shape index: {}]   ;;  %s2710_s8 = inlined_call_operand.hbm [shape: f32[16,128], index: 8, kind: input, shape index: {}]   ;;  %s2711_s9 = inlined_call_operand.vmem [shape: f32[16,128], index: 9, kind: input, shape index: {}]   ;;  %s2712_s10 = inlined_call_operand.hbm [shape: f32[16,128], index: 10, kind: input, shape index: {}]   ;;  %s2713_s11 = inlined_call_operand.hbm [shape: f32[16,512], index: 11, kind: output, shape index: {0}]   ;;  %s2714_s12 = inlined_call_operand.hbm [shape: f32[16,256], index: 12, kind: output, shape index: {1}]   ;;  %s2715_s13 = inlined_call_operand.hbm [shape: f32[16,256], index: 13, kind: output, shape index: {2}]  }
   0x1   :  { %20 = vsyncpa [#allocation9], 0 }
   0x2   :  { %21 = vsyncpa [#allocation12], 0 }
   0x3   :  { %22 = vsyncpa [#allocation15], 0 }
   0x4   :  { %23 = vsyncpa [#allocation18], 0 }
   0x5   :  { %24 = vsyncpa [#allocation7], 0 }
   0x6   :  { %25 = vsyncpa [#allocation21], 0  ;;  %s2358_s25 = smov [#allocation8]   ;;  %s2102_s29 = scalar_lea.hbm %s2703_s1, 32768 }
   0x7   :  { %s43_s26 = sshll.u32 %s2358_s25, 4  ;;  %p2103_p0 = scmp.ne.s32.totalorder %s2703_s1, %s2102_s29  ;;  %s44_s26 = int_to_ptr.vmem [resolvable:$true] %s43_s26 }
   0x8   :  { %p2106_p1 = scmp.lt.u32.totalorder %s2102_s29, %s2703_s1 }
   0xa   :  { %p2108_p2 = pnand %p2106_p1, %p2103_p0 }
   0xc   :  { %2111 = shalt.err (!%p2108_p2)
}
   0xd   :  { %s2112_s17 = scalar_lea.vmem %s44_s26, 32768  ;;  %p2117_p4 = scmp.lt.s32.totalorder %s44_s26, %s44_s26 }
   0xe   :  { %p2113_p3 = scmp.ne.s32.totalorder %s44_s26, %s2112_s17  ;;  %p2118_p5 = scmp.lt.s32.totalorder %s2112_s17, %s2112_s17 }
  0x10   :  { %p2119_p6 = por %p2118_p5, %p2117_p4 }
  0x12   :  { %p2120_p7 = pnand %p2119_p6, %p2113_p3 }
  0x14   :  { %2123 = shalt.err (!%p2120_p7)
}
  0x15   :  { %s2359_s18 = smov 512   ;;  %s2360_s19 = smov 32  }
  0x16   :  { %49 = dma.hbm_to_vmem [thread:$0]  %s2703_s1, 32768, %s44_s26, [#allocation9], %s2359_s18, %s2359_s18, %s2360_s19  }
  0x17   :  { %s2361_s22 = smov [#allocation11]   ;;  %s2362_s24 = smov [#allocation14]  }
  0x18   :  { %s67_s23 = sshll.u32 %s2361_s22, 4  ;;  %s92_s25 = sshll.u32 %s2362_s24, 4  ;;  %s68_s23 = int_to_ptr.vmem [resolvable:$true] %s67_s23  ;;  %s93_s25 = int_to_ptr.vmem [resolvable:$true] %s92_s25 }
  0x19   :  { %s2124_s29 = scalar_lea.hbm %s2705_s3, 16384 }
  0x1a   :  { %p2125_p8 = scmp.ne.s32.totalorder %s2705_s3, %s2124_s29  ;;  %p2128_p9 = scmp.lt.u32.totalorder %s2124_s29, %s2705_s3 }
  0x1c   :  { %p2130_p10 = pnand %p2128_p9, %p2125_p8 }
  0x1e   :  { %2133 = shalt.err (!%p2130_p10)
}
  0x1f   :  { %s2134_s1 = scalar_lea.vmem %s68_s23, 16384  ;;  %p2139_p12 = scmp.lt.s32.totalorder %s68_s23, %s68_s23 }
  0x20   :  { %p2135_p11 = scmp.ne.s32.totalorder %s68_s23, %s2134_s1  ;;  %p2140_p13 = scmp.lt.s32.totalorder %s2134_s1, %s2134_s1 }
  0x22   :  { %p2141_p0 = por %p2140_p13, %p2139_p12 }
  0x24   :  { %p2142_p1 = pnand %p2141_p0, %p2135_p11 }
  0x26   :  { %2145 = shalt.err (!%p2142_p1)
}
  0x27   :  { %s2363_s26 = smov 256   ;;  %s2364_s17 = smov 16  }
  0x28   :  { %73 = dma.hbm_to_vmem [thread:$0]  %s2705_s3, 16384, %s68_s23, [#allocation12], %s2363_s26, %s2363_s26, %s2364_s17  }
  0x29   :  { %s2146_s27 = scalar_lea.hbm %s2708_s6, 32 }
  0x2a   :  { %p2147_p2 = scmp.ne.s32.totalorder %s2708_s6, %s2146_s27  ;;  %p2150_p3 = scmp.lt.u32.totalorder %s2146_s27, %s2708_s6 }
  0x2c   :  { %p2152_p4 = pnand %p2150_p3, %p2147_p2 }
  0x2e   :  { %2155 = shalt.err (!%p2152_p4)
}
  0x2f   :  { %s2156_s15 = scalar_lea.vmem %s93_s25, 32  ;;  %p2161_p6 = scmp.lt.s32.totalorder %s93_s25, %s93_s25 }
  0x30   :  { %p2157_p5 = scmp.ne.s32.totalorder %s93_s25, %s2156_s15  ;;  %p2162_p7 = scmp.lt.s32.totalorder %s2156_s15, %s2156_s15 }
  0x32   :  { %p2163_p8 = por %p2162_p7, %p2161_p6 }
  0x34   :  { %p2164_p9 = pnand %p2163_p8, %p2157_p5 }
  0x36   :  { %2167 = shalt.err (!%p2164_p9)
}
  0x37   :  { %95 = dma.hbm_to_vmem [thread:$0]  %s2708_s6, 32, %s93_s25, [#allocation15]  }
  0x38   :  { %s2365_s16 = smov [#allocation5]   ;;  %s2366_s20 = smov [#allocation10]  }
  0x39   :  { %s31_s1 = sshll.u32 %s2365_s16, 4  ;;  %s55_s21 = sshll.u32 %s2366_s20, 4  ;;  %s32_s1 = int_to_ptr.vmem [resolvable:$true] %s31_s1  ;;  %s56_s21 = int_to_ptr.vmem [resolvable:$true] %s55_s21 }
  0x3a   :  { %s2168_s27 = scalar_lea.hbm %s2702_s0, 1024 }
  0x3b   :  { %p2169_p10 = scmp.ne.s32.totalorder %s2702_s0, %s2168_s27  ;;  %p2172_p11 = scmp.lt.u32.totalorder %s2168_s27, %s2702_s0 }
  0x3d   :  { %p2174_p12 = pnand %p2172_p11, %p2169_p10 }
  0x3f   :  { %2177 = shalt.err (!%p2174_p12)
}
  0x40   :  { %s2178_s6 = scalar_lea.vmem %s32_s1, 1024  ;;  %p2183_p0 = scmp.lt.s32.totalorder %s32_s1, %s32_s1 }
  0x41   :  { %p2179_p13 = scmp.ne.s32.totalorder %s32_s1, %s2178_s6  ;;  %p2184_p1 = scmp.lt.s32.totalorder %s2178_s6, %s2178_s6 }
  0x43   :  { %p2185_p2 = por %p2184_p1, %p2183_p0 }
  0x45   :  { %p2186_p3 = pnand %p2185_p2, %p2179_p13 }
  0x47   :  { %2189 = shalt.err (!%p2186_p3)
}
  0x48   :  { %37 = dma.hbm_to_vmem [thread:$0]  %s2702_s0, 1024, %s32_s1, [#allocation6], %s2359_s18, %s2359_s18, %s2360_s19  }
  0x49   :  { %s2190_s16 = scalar_lea.hbm %s2704_s2, 16384 }
  0x4a   :  { %p2191_p4 = scmp.ne.s32.totalorder %s2704_s2, %s2190_s16  ;;  %p2194_p5 = scmp.lt.u32.totalorder %s2190_s16, %s2704_s2 }
  0x4c   :  { %p2196_p6 = pnand %p2194_p5, %p2191_p4 }
  0x4e   :  { %2199 = shalt.err (!%p2196_p6)
}
  0x4f   :  { %s2200_s28 = scalar_lea.vmem %s56_s21, 16384  ;;  %p2205_p8 = scmp.lt.s32.totalorder %s56_s21, %s56_s21 }
  0x50   :  { %p2201_p7 = scmp.ne.s32.totalorder %s56_s21, %s2200_s28  ;;  %p2206_p9 = scmp.lt.s32.totalorder %s2200_s28, %s2200_s28 }
  0x52   :  { %p2207_p10 = por %p2206_p9, %p2205_p8 }
  0x54   :  { %p2208_p11 = pnand %p2207_p10, %p2201_p7 }
  0x56   :  { %2211 = shalt.err (!%p2208_p11)
}
  0x57   :  { %61 = dma.hbm_to_vmem [thread:$0]  %s2704_s2, 16384, %s56_s21, [#allocation9], %s2363_s26, %s2363_s26, %s2364_s17  }
  0x58   :  { %s2367_s29 = smov [#allocation13]   ;;  %s2368_s14 = smov [#allocation16]  }
  0x59   :  { %s80_s30 = sshll.u32 %s2367_s29, 4  ;;  %s103_s6 = sshll.u32 %s2368_s14, 4  ;;  %s81_s30 = int_to_ptr.vmem [resolvable:$true] %s80_s30  ;;  %s104_s6 = int_to_ptr.vmem [resolvable:$true] %s103_s6 }
  0x5a   :  { %s2212_s3 = scalar_lea.hbm %s2706_s4, 64 }
  0x5b   :  { %p2213_p12 = scmp.ne.s32.totalorder %s2706_s4, %s2212_s3  ;;  %p2216_p13 = scmp.lt.u32.totalorder %s2212_s3, %s2706_s4 }
  0x5d   :  { %p2218_p0 = pnand %p2216_p13, %p2213_p12 }
  0x5f   :  { %2221 = shalt.err (!%p2218_p0)
}
  0x60   :  { %s2222_s2 = scalar_lea.vmem %s81_s30, 64  ;;  %p2227_p2 = scmp.lt.s32.totalorder %s81_s30, %s81_s30 }
  0x61   :  { %p2223_p1 = scmp.ne.s32.totalorder %s81_s30, %s2222_s2  ;;  %p2228_p3 = scmp.lt.s32.totalorder %s2222_s2, %s2222_s2 }
  0x63   :  { %p2229_p4 = por %p2228_p3, %p2227_p2 }
  0x65   :  { %p2230_p5 = pnand %p2229_p4, %p2223_p1 }
  0x67   :  { %2233 = shalt.err (!%p2230_p5)
}
  0x68   :  { %83 = dma.hbm_to_vmem [thread:$0]  %s2706_s4, 64, %s81_s30, [#allocation12]  }
  0x69   :  { %s2234_s0 = scalar_lea.hbm %s2710_s8, 256 }
  0x6a   :  { %p2235_p6 = scmp.ne.s32.totalorder %s2710_s8, %s2234_s0  ;;  %p2238_p7 = scmp.lt.u32.totalorder %s2234_s0, %s2710_s8 }
  0x6c   :  { %p2240_p8 = pnand %p2238_p7, %p2235_p6 }
  0x6e   :  { %2243 = shalt.err (!%p2240_p8)
}
  0x6f   :  { %s2244_s15 = scalar_lea.vmem %s104_s6, 256  ;;  %p2249_p10 = scmp.lt.s32.totalorder %s104_s6, %s104_s6 }
  0x70   :  { %p2245_p9 = scmp.ne.s32.totalorder %s104_s6, %s2244_s15  ;;  %p2250_p11 = scmp.lt.s32.totalorder %s2244_s15, %s2244_s15 }
  0x72   :  { %p2251_p12 = por %p2250_p11, %p2249_p10 }
  0x74   :  { %p2252_p13 = pnand %p2251_p12, %p2245_p9 }
  0x76   :  { %2255 = shalt.err (!%p2252_p13)
}
  0x77   :  { %s2369_s4 = smov 128   ;;  %s2370_s30 = smov 8  }
  0x78   :  { %109 = dma.hbm_to_vmem [thread:$0]  %s2710_s8, 256, %s104_s6, [#allocation15], %s2369_s4, %s2369_s4, %s2370_s30  }
  0x79   :  { %s2371_s16 = smov [#allocation17]   ;;  %s2256_s21 = scalar_lea.hbm %s2712_s10, 256 }
  0x7a   :  { %s117_s20 = sshll.u32 %s2371_s16, 4  ;;  %p2257_p0 = scmp.ne.s32.totalorder %s2712_s10, %s2256_s21  ;;  %s118_s20 = int_to_ptr.vmem [resolvable:$true] %s117_s20 }
  0x7b   :  { %p2260_p1 = scmp.lt.u32.totalorder %s2256_s21, %s2712_s10 }
  0x7d   :  { %p2262_p2 = pnand %p2260_p1, %p2257_p0 }
  0x7f   :  { %2265 = shalt.err (!%p2262_p2)
}
  0x80   :  { %s2266_s1 = scalar_lea.vmem %s118_s20, 256  ;;  %p2271_p4 = scmp.lt.s32.totalorder %s118_s20, %s118_s20 }
  0x81   :  { %p2267_p3 = scmp.ne.s32.totalorder %s118_s20, %s2266_s1  ;;  %p2272_p5 = scmp.lt.s32.totalorder %s2266_s1, %s2266_s1 }
  0x83   :  { %p2273_p6 = por %p2272_p5, %p2271_p4 }
  0x85   :  { %p2274_p7 = pnand %p2273_p6, %p2267_p3 }
  0x87   :  { %2277 = shalt.err (!%p2274_p7)
}
  0x88   :  { %123 = dma.hbm_to_vmem [thread:$0]  %s2712_s10, 256, %s118_s20, [#allocation18], %s2369_s4, %s2369_s4, %s2370_s30  }
  0x89   :  { %2344 = dma.done.wait [#allocation6], 1024  }
  0x8a   :  { %2345 = vsyncadd [#allocation6], 4294966272 }
  0x8b   :  { %2346 = dma.done.wait [#allocation9], 49152  }
  0x8c   :  { %2347 = vsyncadd [#allocation9], 4294918144 }
  0x8d   :  { %2348 = dma.done.wait [#allocation12], 16448  }
  0x8e   :  { %2349 = vsyncadd [#allocation12], 4294950848 }
  0x8f   :  { %2350 = dma.done.wait [#allocation15], 288  }
  0x90   :  { %2351 = vsyncadd [#allocation15], 4294967008 }
  0x91   :  { %2352 = dma.done.wait [#allocation18], 256  }
  0x92   :  { %2353 = vsyncadd [#allocation18], 4294967040  ;;  %v231_v0 = vld [vmem:[#allocation8 + $0x8] sm:$0xff]  ;;  %v230_v2 = vld [vmem:[#allocation8] sm:$0xff]  ;;  %s2372_s10 = smov 64   ;;  %s2373_s16 = smov [#allocation20]  }
  0x93   :  { %v235_v1 = vld [vmem:[#allocation8 + $0x28] sm:$0xff]  ;;  %v234_v4 = vld [vmem:[#allocation8 + $0x20] sm:$0xff]  ;;  %v233_v9 = vld [vmem:[#allocation8 + $0x18] sm:$0xff]  ;;  %s1518_s20 = sshll.u32 %s2373_s16, 4  ;;  %s2374_s22 = smov [#allocation22]   ;;  %s1519_s20 = int_to_ptr.vmem [resolvable:$true] %s1518_s20 }
  0x94   :  { %v1553_v3 = vpack.c.bf16 %v235_v1, %v231_v0  ;;  %v239_v5 = vld [vmem:[#allocation8 + $0x48] sm:$0xff]  ;;  %v1555_v7 = vpack.c.bf16 %v234_v4, %v230_v2  ;;  %v237_v10 = vld [vmem:[#allocation8 + $0x38] sm:$0xff]  ;;  %v238_v11 = vld [vmem:[#allocation8 + $0x40] sm:$0xff]  ;;  %s1530_s2 = sshll.u32 %s2374_s22, 4  ;;  %s2375_s21 = smov [#allocation19]   ;;  %s2640_s2 = int_to_ptr.vmem [resolvable:$true] %s1530_s2 }
  0x95   :  { %v243_v6 = vld [vmem:[#allocation8 + $0x68] sm:$0xff]  ;;  %v1681_v12 = vpack.c.bf16 %v237_v10, %v233_v9  ;;  %v242_v13 = vld [vmem:[#allocation8 + $0x60] sm:$0xff]  ;;  %v232_v14 = vld [vmem:[#allocation8 + $0x10] sm:$0xff]  ;;  %s1506_s24 = sshll.u32 %s2375_s21, 4  ;;  %p2283_p9 = scmp.lt.s32.totalorder %s1519_s20, %s1519_s20  ;;  %s2645_s24 = int_to_ptr.vmem [resolvable:$true] %s1506_s24 }
  0x96   :  { %v1557_v8 = vpack.c.bf16 %v243_v6, %v239_v5  ;;  %1554 = vmatprep.subr.bf16.mxu0 %v1553_v3  ;;  %v236_v15 = vld [vmem:[#allocation8 + $0x30] sm:$0xff]  ;;  %v1559_v16 = vpack.c.bf16 %v242_v13, %v238_v11  ;;  %v247_v18 = vld [vmem:[#allocation8 + $0x88] sm:$0xff]  ;;  %v241_v20 = vld [vmem:[#allocation8 + $0x58] sm:$0xff] }
  0x97   :  { %1556 = vmatpush1.bf16.msra.mxu0 %v1555_v7  ;;  %v1683_v17 = vpack.c.bf16 %v236_v15, %v232_v14  ;;  %v251_v19 = vld [vmem:[#allocation8 + $0xa8] sm:$0xff]  ;;  %1682 = vmatprep.subr.bf16.mxu1 %v1681_v12  ;;  %v245_v22 = vld [vmem:[#allocation8 + $0x78] sm:$0xff]  ;;  %v246_v23 = vld [vmem:[#allocation8 + $0x80] sm:$0xff] }
  0x98   :  { %1558 = vmatprep.subr.bf16.mxu0 %v1557_v8  ;;  %v1561_v21 = vpack.c.bf16 %v251_v19, %v247_v18  ;;  %v250_v24 = vld [vmem:[#allocation8 + $0xa0] sm:$0xff]  ;;  %v1685_v25 = vpack.c.bf16 %v245_v22, %v241_v20  ;;  %v240_v26 = vld [vmem:[#allocation8 + $0x50] sm:$0xff]  ;;  %v255_v28 = vld [vmem:[#allocation8 + $0xc8] sm:$0xff] }
  0x99   :  { %1684 = vmatpush1.bf16.msra.mxu1 %v1683_v17  ;;  %v244_v27 = vld [vmem:[#allocation8 + $0x70] sm:$0xff]  ;;  %v259_v30 = vld [vmem:[#allocation8 + $0xe8] sm:$0xff]  ;;  %v249_v31 = vld [vmem:[#allocation8 + $0x98] sm:$0xff]  ;;  %v1563_v33 = vpack.c.bf16 %v250_v24, %v246_v23 }
  0x9a   :  { %v1687_v29 = vpack.c.bf16 %v244_v27, %v240_v26  ;;  %v253_v32 = vld [vmem:[#allocation8 + $0xb8] sm:$0xff]  ;;  %1686 = vmatprep.subr.bf16.mxu1 %v1685_v25  ;;  %v254_v35 = vld [vmem:[#allocation8 + $0xc0] sm:$0xff]  ;;  %v248_v36 = vld [vmem:[#allocation8 + $0x90] sm:$0xff]  ;;  %v1565_v37 = vpack.c.bf16 %v259_v30, %v255_v28 }
  0x9b   :  { %1560 = vmatpush1.bf16.msra.mxu0 %v1559_v16  ;;  %v1689_v34 = vpack.c.bf16 %v253_v32, %v249_v31  ;;  %v258_v38 = vld [vmem:[#allocation8 + $0xe0] sm:$0xff]  ;;  %v252_v39 = vld [vmem:[#allocation8 + $0xb0] sm:$0xff]  ;;  %v263_v40 = vld [vmem:[#allocation8 + $0x108] sm:$0xff] }
  0x9c   :  { %1562 = vmatprep.subr.bf16.mxu0 %v1561_v21  ;;  %v1691_v41 = vpack.c.bf16 %v252_v39, %v248_v36  ;;  %v267_v42 = vld [vmem:[#allocation8 + $0x128] sm:$0xff]  ;;  %v257_v43 = vld [vmem:[#allocation8 + $0xd8] sm:$0xff]  ;;  %v256_v46 = vld [vmem:[#allocation8 + $0xd0] sm:$0xff]  ;;  %v1567_v48 = vpack.c.bf16 %v258_v38, %v254_v35 }
  0x9d   :  { %1688 = vmatpush1.bf16.msra.mxu1 %v1687_v29  ;;  %v261_v44 = vld [vmem:[#allocation8 + $0xf8] sm:$0xff]  ;;  %v260_v47 = vld [vmem:[#allocation8 + $0xf0] sm:$0xff]  ;;  %v1569_v50 = vpack.c.bf16 %v267_v42, %v263_v40  ;;  %v262_v51 = vld [vmem:[#allocation8 + $0x100] sm:$0xff] }
  0x9e   :  { %1690 = vmatprep.subr.bf16.mxu1 %v1689_v34  ;;  %v1693_v45 = vpack.c.bf16 %v261_v44, %v257_v43  ;;  %v265_v49 = vld [vmem:[#allocation8 + $0x118] sm:$0xff]  ;;  %v266_v52 = vld [vmem:[#allocation8 + $0x120] sm:$0xff]  ;;  %v1695_v54 = vpack.c.bf16 %v260_v47, %v256_v46  ;;  %v271_v55 = vld [vmem:[#allocation8 + $0x148] sm:$0xff] }
  0x9f   :  { %1564 = vmatpush1.bf16.msra.mxu0 %v1563_v33  ;;  %v269_v53 = vld [vmem:[#allocation8 + $0x138] sm:$0xff]  ;;  %v275_v56 = vld [vmem:[#allocation8 + $0x168] sm:$0xff]  ;;  %v264_v58 = vld [vmem:[#allocation8 + $0x110] sm:$0xff]  ;;  %v1571_v60 = vpack.c.bf16 %v266_v52, %v262_v51 }
  0xa0   :  { %1566 = vmatprep.subr.bf16.mxu0 %v1565_v37  ;;  %v1697_v57 = vpack.c.bf16 %v269_v53, %v265_v49  ;;  %v268_v59 = vld [vmem:[#allocation8 + $0x130] sm:$0xff]  ;;  %v273_v61 = vld [vmem:[#allocation8 + $0x158] sm:$0xff]  ;;  %v1573_v63 = vpack.c.bf16 %v275_v56, %v271_v55  ;;  %v270_v0 = vld [vmem:[#allocation8 + $0x140] sm:$0xff] }
  0xa1   :  { %1692 = vmatpush1.bf16.msra.mxu1 %v1691_v41  ;;  %v277_v62 = vld [vmem:[#allocation8 + $0x178] sm:$0xff]  ;;  %v274_v1 = vld [vmem:[#allocation8 + $0x160] sm:$0xff]  ;;  %v1699_v2 = vpack.c.bf16 %v268_v59, %v264_v58  ;;  %v279_v3 = vld [vmem:[#allocation8 + $0x188] sm:$0xff] }
  0xa2   :  { %1694 = vmatprep.subr.bf16.mxu1 %v1693_v45  ;;  %v283_v4 = vld [vmem:[#allocation8 + $0x1a8] sm:$0xff]  ;;  %v1701_v5 = vpack.c.bf16 %v277_v62, %v273_v61  ;;  %v272_v6 = vld [vmem:[#allocation8 + $0x150] sm:$0xff]  ;;  %v1575_v8 = vpack.c.bf16 %v274_v1, %v270_v0  ;;  %v281_v9 = vld [vmem:[#allocation8 + $0x198] sm:$0xff] }
  0xa3   :  { %1568 = vmatpush1.bf16.msra.mxu0 %v1567_v48  ;;  %v276_v7 = vld [vmem:[#allocation8 + $0x170] sm:$0xff]  ;;  %v285_v10 = vld [vmem:[#allocation8 + $0x1b8] sm:$0xff]  ;;  %v1577_v11 = vpack.c.bf16 %v283_v4, %v279_v3  ;;  %v278_v12 = vld [vmem:[#allocation8 + $0x180] sm:$0xff] }
  0xa4   :  { %1570 = vmatprep.subr.bf16.mxu0 %v1569_v50  ;;  %v282_v13 = vld [vmem:[#allocation8 + $0x1a0] sm:$0xff]  ;;  %v1703_v14 = vpack.c.bf16 %v276_v7, %v272_v6  ;;  %v287_v15 = vld [vmem:[#allocation8 + $0x1c8] sm:$0xff]  ;;  %v1705_v17 = vpack.c.bf16 %v285_v10, %v281_v9  ;;  %v280_v18 = vld [vmem:[#allocation8 + $0x190] sm:$0xff] }
  0xa5   :  { %1696 = vmatpush1.bf16.msra.mxu1 %v1695_v54  ;;  %v291_v16 = vld [vmem:[#allocation8 + $0x1e8] sm:$0xff]  ;;  %v284_v19 = vld [vmem:[#allocation8 + $0x1b0] sm:$0xff]  ;;  %v1579_v20 = vpack.c.bf16 %v282_v13, %v278_v12  ;;  %v289_v21 = vld [vmem:[#allocation8 + $0x1d8] sm:$0xff] }
  0xa6   :  { %1698 = vmatprep.subr.bf16.mxu1 %v1697_v57  ;;  %v293_v22 = vld [vmem:[#allocation8 + $0x1f8] sm:$0xff]  ;;  %v1581_v23 = vpack.c.bf16 %v291_v16, %v287_v15  ;;  %v286_v24 = vld [vmem:[#allocation8 + $0x1c0] sm:$0xff]  ;;  %v1707_v26 = vpack.c.bf16 %v284_v19, %v280_v18  ;;  %v295_v27 = vld [vmem:[#allocation8 + $0x208] sm:$0xff] }
  0xa7   :  { %1572 = vmatpush1.bf16.msra.mxu0 %v1571_v60  ;;  %v290_v25 = vld [vmem:[#allocation8 + $0x1e0] sm:$0xff]  ;;  %v299_v28 = vld [vmem:[#allocation8 + $0x228] sm:$0xff]  ;;  %v1709_v29 = vpack.c.bf16 %v293_v22, %v289_v21  ;;  %v288_v30 = vld [vmem:[#allocation8 + $0x1d0] sm:$0xff] }
  0xa8   :  { %1574 = vmatprep.subr.bf16.mxu0 %v1573_v63  ;;  %v292_v31 = vld [vmem:[#allocation8 + $0x1f0] sm:$0xff]  ;;  %v1583_v32 = vpack.c.bf16 %v290_v25, %v286_v24  ;;  %v297_v33 = vld [vmem:[#allocation8 + $0x218] sm:$0xff]  ;;  %v1585_v35 = vpack.c.bf16 %v299_v28, %v295_v27  ;;  %v294_v36 = vld [vmem:[#allocation8 + $0x200] sm:$0xff] }
  0xa9   :  { %1700 = vmatpush1.bf16.msra.mxu1 %v1699_v2  ;;  %v301_v34 = vld [vmem:[#allocation8 + $0x238] sm:$0xff]  ;;  %v298_v37 = vld [vmem:[#allocation8 + $0x220] sm:$0xff]  ;;  %v1711_v38 = vpack.c.bf16 %v292_v31, %v288_v30  ;;  %v303_v39 = vld [vmem:[#allocation8 + $0x248] sm:$0xff] }
  0xaa   :  { %1702 = vmatprep.subr.bf16.mxu1 %v1701_v5  ;;  %v307_v40 = vld [vmem:[#allocation8 + $0x268] sm:$0xff]  ;;  %v1713_v41 = vpack.c.bf16 %v301_v34, %v297_v33  ;;  %v296_v42 = vld [vmem:[#allocation8 + $0x210] sm:$0xff]  ;;  %v1587_v44 = vpack.c.bf16 %v298_v37, %v294_v36  ;;  %v305_v45 = vld [vmem:[#allocation8 + $0x258] sm:$0xff] }
  0xab   :  { %1576 = vmatpush1.bf16.msra.mxu0 %v1575_v8  ;;  %v300_v43 = vld [vmem:[#allocation8 + $0x230] sm:$0xff]  ;;  %v309_v46 = vld [vmem:[#allocation8 + $0x278] sm:$0xff]  ;;  %v1589_v47 = vpack.c.bf16 %v307_v40, %v303_v39  ;;  %v302_v48 = vld [vmem:[#allocation8 + $0x240] sm:$0xff] }
  0xac   :  { %1578 = vmatprep.subr.bf16.mxu0 %v1577_v11  ;;  %v306_v49 = vld [vmem:[#allocation8 + $0x260] sm:$0xff]  ;;  %v1715_v50 = vpack.c.bf16 %v300_v43, %v296_v42  ;;  %v311_v51 = vld [vmem:[#allocation8 + $0x288] sm:$0xff]  ;;  %v1717_v53 = vpack.c.bf16 %v309_v46, %v305_v45  ;;  %v304_v54 = vld [vmem:[#allocation8 + $0x250] sm:$0xff] }
  0xad   :  { %1704 = vmatpush1.bf16.msra.mxu1 %v1703_v14  ;;  %v315_v52 = vld [vmem:[#allocation8 + $0x2a8] sm:$0xff]  ;;  %v308_v55 = vld [vmem:[#allocation8 + $0x270] sm:$0xff]  ;;  %v1591_v56 = vpack.c.bf16 %v306_v49, %v302_v48  ;;  %v313_v57 = vld [vmem:[#allocation8 + $0x298] sm:$0xff] }
  0xae   :  { %1706 = vmatprep.subr.bf16.mxu1 %v1705_v17  ;;  %v317_v58 = vld [vmem:[#allocation8 + $0x2b8] sm:$0xff]  ;;  %v1593_v59 = vpack.c.bf16 %v315_v52, %v311_v51  ;;  %v310_v60 = vld [vmem:[#allocation8 + $0x280] sm:$0xff]  ;;  %v1719_v62 = vpack.c.bf16 %v308_v55, %v304_v54  ;;  %v319_v63 = vld [vmem:[#allocation8 + $0x2c8] sm:$0xff] }
  0xaf   :  { %1580 = vmatpush1.bf16.msra.mxu0 %v1579_v20  ;;  %v314_v61 = vld [vmem:[#allocation8 + $0x2a0] sm:$0xff]  ;;  %v323_v0 = vld [vmem:[#allocation8 + $0x2e8] sm:$0xff]  ;;  %v1721_v1 = vpack.c.bf16 %v317_v58, %v313_v57  ;;  %v312_v2 = vld [vmem:[#allocation8 + $0x290] sm:$0xff] }
  0xb0   :  { %1582 = vmatprep.subr.bf16.mxu0 %v1581_v23  ;;  %v316_v3 = vld [vmem:[#allocation8 + $0x2b0] sm:$0xff]  ;;  %v1595_v4 = vpack.c.bf16 %v314_v61, %v310_v60  ;;  %v321_v5 = vld [vmem:[#allocation8 + $0x2d8] sm:$0xff]  ;;  %v1597_v7 = vpack.c.bf16 %v323_v0, %v319_v63  ;;  %v318_v8 = vld [vmem:[#allocation8 + $0x2c0] sm:$0xff] }
  0xb1   :  { %1708 = vmatpush1.bf16.msra.mxu1 %v1707_v26  ;;  %v325_v6 = vld [vmem:[#allocation8 + $0x2f8] sm:$0xff]  ;;  %v322_v9 = vld [vmem:[#allocation8 + $0x2e0] sm:$0xff]  ;;  %v2554_v10 = vld [vmem:[#allocation5 + $0x8] sm:$0xff]  ;;  %v1723_v11 = vpack.c.bf16 %v316_v3, %v312_v2 }
  0xb2   :  { %1710 = vmatprep.subr.bf16.mxu1 %v1709_v29  ;;  %v327_v12 = vld [vmem:[#allocation8 + $0x308] sm:$0xff]  ;;  %550 = vmatprep.mubr.f32.mxu0 %v2554_v10  ;;  %v1725_v14 = vpack.c.bf16 %v325_v6, %v321_v5  ;;  %v320_v15 = vld [vmem:[#allocation8 + $0x2d0] sm:$0xff]  ;;  %v1599_v17 = vpack.c.bf16 %v322_v9, %v318_v8  ;;  %v329_v18 = vld [vmem:[#allocation8 + $0x318] sm:$0xff] }
  0xb3   :  { %1584 = vmatpush1.bf16.msra.mxu0 %v1583_v32  ;;  %v331_v13 = vld [vmem:[#allocation8 + $0x328] sm:$0xff]  ;;  %v324_v16 = vld [vmem:[#allocation8 + $0x2f0] sm:$0xff]  ;;  %704 = vmatprep.mubr.f32.mxu1 %v2554_v10  ;;  %v333_v19 = vld [vmem:[#allocation8 + $0x338] sm:$0xff] }
  0xb4   :  { %1586 = vmatprep.subr.bf16.mxu0 %v1585_v35  ;;  %v1601_v20 = vpack.c.bf16 %v331_v13, %v327_v12  ;;  %v326_v21 = vld [vmem:[#allocation8 + $0x300] sm:$0xff]  ;;  %v1727_v23 = vpack.c.bf16 %v324_v16, %v320_v15  ;;  %v335_v24 = vld [vmem:[#allocation8 + $0x348] sm:$0xff]  ;;  %v1729_v26 = vpack.c.bf16 %v333_v19, %v329_v18  ;;  %v328_v27 = vld [vmem:[#allocation8 + $0x310] sm:$0xff] }
  0xb5   :  { %1712 = vmatpush1.bf16.msra.mxu1 %v1711_v38  ;;  %v330_v22 = vld [vmem:[#allocation8 + $0x320] sm:$0xff]  ;;  %v339_v25 = vld [vmem:[#allocation8 + $0x368] sm:$0xff]  ;;  %v332_v28 = vld [vmem:[#allocation8 + $0x330] sm:$0xff] }
  0xb6   :  { %1714 = vmatprep.subr.bf16.mxu1 %v1713_v41  ;;  %v1603_v29 = vpack.c.bf16 %v330_v22, %v326_v21  ;;  %v337_v30 = vld [vmem:[#allocation8 + $0x358] sm:$0xff]  ;;  %v1605_v32 = vpack.c.bf16 %v339_v25, %v335_v24  ;;  %v334_v33 = vld [vmem:[#allocation8 + $0x340] sm:$0xff]  ;;  %v1731_v35 = vpack.c.bf16 %v332_v28, %v328_v27  ;;  %v343_v36 = vld [vmem:[#allocation8 + $0x388] sm:$0xff] }
  0xb7   :  { %1588 = vmatpush1.bf16.msra.mxu0 %v1587_v44  ;;  %v341_v31 = vld [vmem:[#allocation8 + $0x378] sm:$0xff]  ;;  %v338_v34 = vld [vmem:[#allocation8 + $0x360] sm:$0xff]  ;;  %v347_v37 = vld [vmem:[#allocation8 + $0x3a8] sm:$0xff] }
  0xb8   :  { %1590 = vmatprep.subr.bf16.mxu0 %v1589_v47  ;;  %v1733_v38 = vpack.c.bf16 %v341_v31, %v337_v30  ;;  %v336_v39 = vld [vmem:[#allocation8 + $0x350] sm:$0xff]  ;;  %v1607_v41 = vpack.c.bf16 %v338_v34, %v334_v33  ;;  %v345_v42 = vld [vmem:[#allocation8 + $0x398] sm:$0xff]  ;;  %v1609_v44 = vpack.c.bf16 %v347_v37, %v343_v36  ;;  %v342_v45 = vld [vmem:[#allocation8 + $0x380] sm:$0xff] }
  0xb9   :  { %1716 = vmatpush1.bf16.msra.mxu1 %v1715_v50  ;;  %v340_v40 = vld [vmem:[#allocation8 + $0x370] sm:$0xff]  ;;  %v349_v43 = vld [vmem:[#allocation8 + $0x3b8] sm:$0xff]  ;;  %v346_v46 = vld [vmem:[#allocation8 + $0x3a0] sm:$0xff] }
  0xba   :  { %1718 = vmatprep.subr.bf16.mxu1 %v1717_v53  ;;  %v1735_v47 = vpack.c.bf16 %v340_v40, %v336_v39  ;;  %v351_v48 = vld [vmem:[#allocation8 + $0x3c8] sm:$0xff]  ;;  %v1737_v50 = vpack.c.bf16 %v349_v43, %v345_v42  ;;  %v344_v51 = vld [vmem:[#allocation8 + $0x390] sm:$0xff]  ;;  %v1611_v53 = vpack.c.bf16 %v346_v46, %v342_v45  ;;  %v353_v54 = vld [vmem:[#allocation8 + $0x3d8] sm:$0xff] }
  0xbb   :  { %1592 = vmatpush1.bf16.msra.mxu0 %v1591_v56  ;;  %v355_v49 = vld [vmem:[#allocation8 + $0x3e8] sm:$0xff]  ;;  %v348_v52 = vld [vmem:[#allocation8 + $0x3b0] sm:$0xff]  ;;  %v357_v55 = vld [vmem:[#allocation8 + $0x3f8] sm:$0xff] }
  0xbc   :  { %1594 = vmatprep.subr.bf16.mxu0 %v1593_v59  ;;  %v1613_v56 = vpack.c.bf16 %v355_v49, %v351_v48  ;;  %v350_v57 = vld [vmem:[#allocation8 + $0x3c0] sm:$0xff]  ;;  %v1739_v59 = vpack.c.bf16 %v348_v52, %v344_v51  ;;  %v359_v60 = vld [vmem:[#allocation8 + $0x408] sm:$0xff]  ;;  %v352_v63 = vld [vmem:[#allocation8 + $0x3d0] sm:$0xff] }
  0xbd   :  { %1720 = vmatpush1.bf16.msra.mxu1 %v1719_v62  ;;  %v354_v58 = vld [vmem:[#allocation8 + $0x3e0] sm:$0xff]  ;;  %v363_v61 = vld [vmem:[#allocation8 + $0x428] sm:$0xff]  ;;  %v1741_v62 = vpack.c.bf16 %v357_v55, %v353_v54  ;;  %v356_v0 = vld [vmem:[#allocation8 + $0x3f0] sm:$0xff] }
  0xbe   :  { %1722 = vmatprep.subr.bf16.mxu1 %v1721_v1  ;;  %v1615_v1 = vpack.c.bf16 %v354_v58, %v350_v57  ;;  %v361_v2 = vld [vmem:[#allocation8 + $0x418] sm:$0xff]  ;;  %v358_v5 = vld [vmem:[#allocation8 + $0x400] sm:$0xff]  ;;  %v367_v8 = vld [vmem:[#allocation8 + $0x448] sm:$0xff] }
  0xbf   :  { %1596 = vmatpush1.bf16.msra.mxu0 %v1595_v4  ;;  %v365_v3 = vld [vmem:[#allocation8 + $0x438] sm:$0xff]  ;;  %v1617_v4 = vpack.c.bf16 %v363_v61, %v359_v60  ;;  %v362_v6 = vld [vmem:[#allocation8 + $0x420] sm:$0xff]  ;;  %v371_v9 = vld [vmem:[#allocation8 + $0x468] sm:$0xff] }
  0xc0   :  { %1598 = vmatprep.subr.bf16.mxu0 %v1597_v7  ;;  %v1743_v7 = vpack.c.bf16 %v356_v0, %v352_v63  ;;  %v360_v12 = vld [vmem:[#allocation8 + $0x410] sm:$0xff]  ;;  %v1619_v15 = vpack.c.bf16 %v362_v6, %v358_v5  ;;  %v369_v16 = vld [vmem:[#allocation8 + $0x458] sm:$0xff]  ;;  %v1621_v18 = vpack.c.bf16 %v371_v9, %v367_v8  ;;  %v366_v19 = vld [vmem:[#allocation8 + $0x440] sm:$0xff] }
  0xc1   :  { %1724 = vmatpush1.bf16.msra.mxu1 %v1723_v11  ;;  %v1745_v11 = vpack.c.bf16 %v365_v3, %v361_v2  ;;  %v364_v13 = vld [vmem:[#allocation8 + $0x430] sm:$0xff]  ;;  %v375_v22 = vld [vmem:[#allocation8 + $0x488] sm:$0xff]  ;;  %v377_v28 = vld [vmem:[#allocation8 + $0x498] sm:$0xff] }
  0xc2   :  { %1726 = vmatprep.subr.bf16.mxu1 %v1725_v14  ;;  %v214_v14 = vld [vmem:[#allocation5] sm:$0xff]  ;;  %v1747_v21 = vpack.c.bf16 %v364_v13, %v360_v12  ;;  %v368_v25 = vld [vmem:[#allocation8 + $0x450] sm:$0xff]  ;;  %v383_v34 = vld [vmem:[#allocation8 + $0x4c8] sm:$0xff] }
  0xc3   :  { %1600 = vmatpush1.bf16.msra.mxu0 %v1599_v17  ;;  %v373_v17 = vld [vmem:[#allocation8 + $0x478] sm:$0xff]  ;;  %v374_v31 = vld [vmem:[#allocation8 + $0x480] sm:$0xff]  ;;  %v376_v37 = vld [vmem:[#allocation8 + $0x490] sm:$0xff] }
  0xc4   :  { %1602 = vmatprep.subr.bf16.mxu0 %v1601_v20  ;;  %v370_v20 = vld [vmem:[#allocation8 + $0x460] sm:$0xff]  ;;  %v1749_v24 = vpack.c.bf16 %v373_v17, %v369_v16  ;;  %v385_v40 = vld [vmem:[#allocation8 + $0x4d8] sm:$0xff]  ;;  %v391_v46 = vld [vmem:[#allocation8 + $0x508] sm:$0xff] }
  0xc5   :  { %1728 = vmatpush1.bf16.msra.mxu1 %v1727_v23  ;;  %v379_v23 = vld [vmem:[#allocation8 + $0x4a8] sm:$0xff]  ;;  %v1623_v27 = vpack.c.bf16 %v370_v20, %v366_v19  ;;  %v382_v43 = vld [vmem:[#allocation8 + $0x4c0] sm:$0xff]  ;;  %v384_v49 = vld [vmem:[#allocation8 + $0x4d0] sm:$0xff] }
  0xc6   :  { %1730 = vmatprep.subr.bf16.mxu1 %v1729_v26  ;;  %v372_v26 = vld [vmem:[#allocation8 + $0x470] sm:$0xff]  ;;  %v1625_v30 = vpack.c.bf16 %v379_v23, %v375_v22  ;;  %v393_v52 = vld [vmem:[#allocation8 + $0x518] sm:$0xff]  ;;  %v390_v55 = vld [vmem:[#allocation8 + $0x500] sm:$0xff] }
  0xc7   :  { %1604 = vmatpush1.bf16.msra.mxu0 %v1603_v29  ;;  %v381_v29 = vld [vmem:[#allocation8 + $0x4b8] sm:$0xff]  ;;  %v1751_v33 = vpack.c.bf16 %v372_v26, %v368_v25  ;;  %v399_v58 = vld [vmem:[#allocation8 + $0x548] sm:$0xff]  ;;  %v392_v61 = vld [vmem:[#allocation8 + $0x510] sm:$0xff] }
  0xc8   :  { %1606 = vmatprep.subr.bf16.mxu0 %v1605_v32  ;;  %v378_v32 = vld [vmem:[#allocation8 + $0x4a0] sm:$0xff]  ;;  %v1753_v36 = vpack.c.bf16 %v381_v29, %v377_v28  ;;  %v401_v0 = vld [vmem:[#allocation8 + $0x558] sm:$0xff]  ;;  %v407_v5 = vld [vmem:[#allocation8 + $0x588] sm:$0xff] }
  0xc9   :  { %1732 = vmatpush1.bf16.msra.mxu1 %v1731_v35  ;;  %v387_v35 = vld [vmem:[#allocation8 + $0x4e8] sm:$0xff]  ;;  %v1627_v39 = vpack.c.bf16 %v378_v32, %v374_v31  ;;  %v398_v3 = vld [vmem:[#allocation8 + $0x540] sm:$0xff]  ;;  %v400_v12 = vld [vmem:[#allocation8 + $0x550] sm:$0xff] }
  0xca   :  { %1734 = vmatprep.subr.bf16.mxu1 %v1733_v38  ;;  %v380_v38 = vld [vmem:[#allocation8 + $0x4b0] sm:$0xff]  ;;  %v1629_v42 = vpack.c.bf16 %v387_v35, %v383_v34  ;;  %v2558_v8 = vld [vmem:[#allocation5 + $0x28] sm:$0xff]  ;;  %v2560_v9 = vld [vmem:[#allocation5 + $0x20] sm:$0xff] }
  0xcb   :  { %1608 = vmatpush1.bf16.msra.mxu0 %v1607_v41  ;;  %v389_v41 = vld [vmem:[#allocation8 + $0x4f8] sm:$0xff]  ;;  %v1755_v45 = vpack.c.bf16 %v380_v38, %v376_v37  ;;  %v404_v13 = vld [vmem:[#allocation8 + $0x570] sm:$0xff]  ;;  %v410_v19 = vld [vmem:[#allocation8 + $0x5a0] sm:$0xff] }
  0xcc   :  { %1610 = vmatprep.subr.bf16.mxu0 %v1609_v44  ;;  %v386_v44 = vld [vmem:[#allocation8 + $0x4e0] sm:$0xff]  ;;  %v1757_v48 = vpack.c.bf16 %v389_v41, %v385_v40  ;;  %v413_v16 = vld [vmem:[#allocation8 + $0x5b8] sm:$0xff]  ;;  %v415_v22 = vld [vmem:[#allocation8 + $0x5c8] sm:$0xff] }
  0xcd   :  { %1736 = vmatpush1.bf16.msra.mxu1 %v1735_v47  ;;  %v395_v47 = vld [vmem:[#allocation8 + $0x528] sm:$0xff]  ;;  %v1631_v51 = vpack.c.bf16 %v386_v44, %v382_v43  ;;  %v2565_v20 = vld [vmem:[#allocation5 + $0x18] sm:$0xff]  ;;  %v408_v25 = vld [vmem:[#allocation8 + $0x590] sm:$0xff] }
  0xce   :  { %1738 = vmatprep.subr.bf16.mxu1 %v1737_v50  ;;  %v388_v50 = vld [vmem:[#allocation8 + $0x4f0] sm:$0xff]  ;;  %v1633_v54 = vpack.c.bf16 %v395_v47, %v391_v46  ;;  %v419_v23 = vld [vmem:[#allocation8 + $0x5e8] sm:$0xff]  ;;  %v417_v28 = vld [vmem:[#allocation8 + $0x5d8] sm:$0xff] }
  0xcf   :  { %1612 = vmatpush1.bf16.msra.mxu0 %v1611_v53  ;;  %v397_v53 = vld [vmem:[#allocation8 + $0x538] sm:$0xff]  ;;  %v1759_v57 = vpack.c.bf16 %v388_v50, %v384_v49  ;;  %v412_v26 = vld [vmem:[#allocation8 + $0x5b0] sm:$0xff]  ;;  %v414_v31 = vld [vmem:[#allocation8 + $0x5c0] sm:$0xff] }
  0xd0   :  { %1614 = vmatprep.subr.bf16.mxu0 %v1613_v56  ;;  %v394_v56 = vld [vmem:[#allocation8 + $0x520] sm:$0xff]  ;;  %v1761_v60 = vpack.c.bf16 %v397_v53, %v393_v52  ;;  %v421_v29 = vld [vmem:[#allocation8 + $0x5f8] sm:$0xff]  ;;  %v423_v34 = vld [vmem:[#allocation8 + $0x608] sm:$0xff] }
  0xd1   :  { %1740 = vmatpush1.bf16.msra.mxu1 %v1739_v59  ;;  %v403_v59 = vld [vmem:[#allocation8 + $0x568] sm:$0xff]  ;;  %v1635_v63 = vpack.c.bf16 %v394_v56, %v390_v55  ;;  %v418_v32 = vld [vmem:[#allocation8 + $0x5e0] sm:$0xff]  ;;  %v416_v37 = vld [vmem:[#allocation8 + $0x5d0] sm:$0xff] }
  0xd2   :  { %1742 = vmatprep.subr.bf16.mxu1 %v1741_v62  ;;  %v396_v62 = vld [vmem:[#allocation8 + $0x530] sm:$0xff]  ;;  %v1637_v2 = vpack.c.bf16 %v403_v59, %v399_v58  ;;  %v427_v35 = vld [vmem:[#allocation8 + $0x628] sm:$0xff]  ;;  %v425_v40 = vld [vmem:[#allocation8 + $0x618] sm:$0xff] }
  0xd3   :  { %1616 = vmatpush1.bf16.msra.mxu0 %v1615_v1  ;;  %v405_v1 = vld [vmem:[#allocation8 + $0x578] sm:$0xff]  ;;  %v1763_v6 = vpack.c.bf16 %v396_v62, %v392_v61  ;;  %v420_v38 = vld [vmem:[#allocation8 + $0x5f0] sm:$0xff]  ;;  %v422_v43 = vld [vmem:[#allocation8 + $0x600] sm:$0xff] }
  0xd4   :  { %1618 = vmatprep.subr.bf16.mxu0 %v1617_v4  ;;  %v402_v4 = vld [vmem:[#allocation8 + $0x560] sm:$0xff]  ;;  %v429_v41 = vld [vmem:[#allocation8 + $0x638] sm:$0xff]  ;;  %v431_v46 = vld [vmem:[#allocation8 + $0x648] sm:$0xff] }
  0xd5   :  { %1744 = vmatpush1.bf16.msra.mxu1 %v1743_v7  ;;  %v411_v7 = vld [vmem:[#allocation8 + $0x5a8] sm:$0xff]  ;;  %v426_v44 = vld [vmem:[#allocation8 + $0x620] sm:$0xff]  ;;  %v424_v49 = vld [vmem:[#allocation8 + $0x610] sm:$0xff] }
  0xd6   :  { %551 = vmatmul.mubr.f32.vlgmr.msra.gmra.mrb[0].mxu0 %v214_v14  ;;  %1746 = vmatprep.subr.bf16.mxu1 %v1745_v11  ;;  %v1765_v11 = vpack.c.bf16 %v405_v1, %v401_v0  ;;  %v1641_v17 = vpack.c.bf16 %v411_v7, %v407_v5  ;;  %v435_v47 = vld [vmem:[#allocation8 + $0x668] sm:$0xff]  ;;  %v428_v50 = vld [vmem:[#allocation8 + $0x630] sm:$0xff]  ;;  %v433_v52 = vld [vmem:[#allocation8 + $0x658] sm:$0xff] }
  0xd7   :  { %1620 = vmatpush1.bf16.msra.mxu0 %v1619_v15  ;;  %556 = vmatprep.mubr.f32.mxu0 %v2558_v8  ;;  %v409_v15 = vld [vmem:[#allocation8 + $0x598] sm:$0xff]  ;;  %v430_v55 = vld [vmem:[#allocation8 + $0x640] sm:$0xff]  ;;  %v439_v58 = vld [vmem:[#allocation8 + $0x688] sm:$0xff] }
  0xd8   :  { %1622 = vmatprep.subr.bf16.mxu0 %v1621_v18  ;;  %705 = vmatmul.mubr.f32.vlgmr.msra.gmra.mrb[0].mxu1 %v214_v14  ;;  %v1639_v14 = vpack.c.bf16 %v402_v4, %v398_v3  ;;  %v406_v18 = vld [vmem:[#allocation8 + $0x580] sm:$0xff]  ;;  %v437_v53 = vld [vmem:[#allocation8 + $0x678] sm:$0xff]  ;;  %v443_v59 = vld [vmem:[#allocation8 + $0x6a8] sm:$0xff] }
  0xd9   :  { %1748 = vmatpush1.bf16.msra.mxu1 %v1747_v21  ;;  %710 = vmatprep.mubr.f32.mxu1 %v2558_v8  ;;  %v1767_v21 = vpack.c.bf16 %v404_v13, %v400_v12  ;;  %v434_v56 = vld [vmem:[#allocation8 + $0x660] sm:$0xff]  ;;  %v432_v61 = vld [vmem:[#allocation8 + $0x650] sm:$0xff]  ;;  %v441_v0 = vld [vmem:[#allocation8 + $0x698] sm:$0xff] }
  0xda   :  { %1750 = vmatprep.subr.bf16.mxu1 %v1749_v24  ;;  %557 = vmatmul.mubr.f32.gmra.mrb[2].mxu0 %v2560_v9  ;;  %v1769_v24 = vpack.c.bf16 %v413_v16, %v409_v15  ;;  %v436_v62 = vld [vmem:[#allocation8 + $0x670] sm:$0xff]  ;;  %v445_v1 = vld [vmem:[#allocation8 + $0x6b8] sm:$0xff]  ;;  %v438_v3 = vld [vmem:[#allocation8 + $0x680] sm:$0xff] }
  0xdb   :  { %1624 = vmatpush1.bf16.msra.mxu0 %v1623_v27  ;;  %627 = vmatprep.mubr.f32.mxu0 %v2565_v20  ;;  %v1643_v27 = vpack.c.bf16 %v410_v19, %v406_v18  ;;  %v442_v4 = vld [vmem:[#allocation8 + $0x6a0] sm:$0xff]  ;;  %v1783_v5 = vpack.c.bf16 %v436_v62, %v432_v61  ;;  %v451_v7 = vld [vmem:[#allocation8 + $0x6e8] sm:$0xff]  ;;  %v440_v12 = vld [vmem:[#allocation8 + $0x690] sm:$0xff] }
  0xdc   :  { %1626 = vmatprep.subr.bf16.mxu0 %v1625_v30  ;;  %711 = vmatmul.mubr.f32.gmra.mrb[2].mxu1 %v2560_v9  ;;  %v1645_v30 = vpack.c.bf16 %v419_v23, %v415_v22  ;;  %v444_v13 = vld [vmem:[#allocation8 + $0x6b0] sm:$0xff]  ;;  %v449_v15 = vld [vmem:[#allocation8 + $0x6d8] sm:$0xff]  ;;  %v446_v18 = vld [vmem:[#allocation8 + $0x6c0] sm:$0xff] }
  0xdd   :  { %1752 = vmatpush1.bf16.msra.mxu1 %v1751_v33  ;;  %781 = vmatprep.mubr.f32.mxu1 %v2565_v20  ;;  %v1771_v33 = vpack.c.bf16 %v412_v26, %v408_v25  ;;  %v453_v16 = vld [vmem:[#allocation8 + $0x6f8] sm:$0xff]  ;;  %v450_v19 = vld [vmem:[#allocation8 + $0x6e0] sm:$0xff]  ;;  %v455_v22 = vld [vmem:[#allocation8 + $0x708] sm:$0xff] }
  0xde   :  { %1754 = vmatprep.subr.bf16.mxu1 %v1753_v36  ;;  %v1773_v36 = vpack.c.bf16 %v421_v29, %v417_v28  ;;  %v459_v23 = vld [vmem:[#allocation8 + $0x728] sm:$0xff]  ;;  %v448_v25 = vld [vmem:[#allocation8 + $0x6d0] sm:$0xff]  ;;  %v457_v28 = vld [vmem:[#allocation8 + $0x718] sm:$0xff] }
  0xdf   :  { %1628 = vmatpush1.bf16.msra.mxu0 %v1627_v39  ;;  %v1647_v39 = vpack.c.bf16 %v418_v32, %v414_v31  ;;  %v452_v26 = vld [vmem:[#allocation8 + $0x6f0] sm:$0xff]  ;;  %v461_v29 = vld [vmem:[#allocation8 + $0x738] sm:$0xff]  ;;  %v454_v31 = vld [vmem:[#allocation8 + $0x700] sm:$0xff] }
  0xe0   :  { %1630 = vmatprep.subr.bf16.mxu0 %v1629_v42  ;;  %v1649_v42 = vpack.c.bf16 %v427_v35, %v423_v34  ;;  %v458_v32 = vld [vmem:[#allocation8 + $0x720] sm:$0xff]  ;;  %v463_v34 = vld [vmem:[#allocation8 + $0x748] sm:$0xff]  ;;  %v472_v61 = vld [vmem:[#allocation8 + $0x790] sm:$0xff] }
  0xe1   :  { %1756 = vmatpush1.bf16.msra.mxu1 %v1755_v45  ;;  %v1775_v45 = vpack.c.bf16 %v420_v38, %v416_v37  ;;  %v467_v35 = vld [vmem:[#allocation8 + $0x768] sm:$0xff]  ;;  %v456_v37 = vld [vmem:[#allocation8 + $0x710] sm:$0xff] }
  0xe2   :  { %1758 = vmatprep.subr.bf16.mxu1 %v1757_v48  ;;  %v1777_v48 = vpack.c.bf16 %v429_v41, %v425_v40  ;;  %v460_v38 = vld [vmem:[#allocation8 + $0x730] sm:$0xff]  ;;  %v465_v40 = vld [vmem:[#allocation8 + $0x758] sm:$0xff] }
  0xe3   :  { %1632 = vmatpush1.bf16.msra.mxu0 %v1631_v51  ;;  %v1651_v51 = vpack.c.bf16 %v426_v44, %v422_v43  ;;  %v469_v41 = vld [vmem:[#allocation8 + $0x778] sm:$0xff]  ;;  %v462_v43 = vld [vmem:[#allocation8 + $0x740] sm:$0xff]  ;;  %v476_v62 = vld [vmem:[#allocation8 + $0x7b0] sm:$0xff] }
  0xe4   :  { %1634 = vmatprep.subr.bf16.mxu0 %v1633_v54  ;;  %v1653_v54 = vpack.c.bf16 %v435_v47, %v431_v46  ;;  %v466_v44 = vld [vmem:[#allocation8 + $0x760] sm:$0xff]  ;;  %v471_v46 = vld [vmem:[#allocation8 + $0x788] sm:$0xff] }
  0xe5   :  { %1760 = vmatpush1.bf16.msra.mxu1 %v1759_v57  ;;  %v1779_v57 = vpack.c.bf16 %v428_v50, %v424_v49  ;;  %v475_v47 = vld [vmem:[#allocation8 + $0x7a8] sm:$0xff]  ;;  %v464_v49 = vld [vmem:[#allocation8 + $0x750] sm:$0xff] }
  0xe6   :  { %1762 = vmatprep.subr.bf16.mxu1 %v1761_v60  ;;  %v1781_v60 = vpack.c.bf16 %v437_v53, %v433_v52  ;;  %v468_v50 = vld [vmem:[#allocation8 + $0x770] sm:$0xff]  ;;  %v473_v52 = vld [vmem:[#allocation8 + $0x798] sm:$0xff] }
  0xe7   :  { %1636 = vmatpush1.bf16.msra.mxu0 %v1635_v63  ;;  %v1655_v63 = vpack.c.bf16 %v434_v56, %v430_v55  ;;  %v477_v53 = vld [vmem:[#allocation8 + $0x7b8] sm:$0xff]  ;;  %v470_v55 = vld [vmem:[#allocation8 + $0x780] sm:$0xff] }
  0xe8   :  { %1638 = vmatprep.subr.bf16.mxu0 %v1637_v2  ;;  %v1657_v2 = vpack.c.bf16 %v443_v59, %v439_v58  ;;  %v474_v56 = vld [vmem:[#allocation8 + $0x7a0] sm:$0xff]  ;;  %v479_v58 = vld [vmem:[#allocation8 + $0x7c8] sm:$0xff] }
  0xe9   :  { %1764 = vmatpush1.bf16.msra.mxu1 %v1763_v6  ;;  %v447_v6 = vld [vmem:[#allocation8 + $0x6c8] sm:$0xff] }
  0xea   :  { %1766 = vmatprep.subr.bf16.mxu1 %v1765_v11  ;;  %v1785_v11 = vpack.c.bf16 %v445_v1, %v441_v0  ;;  %v483_v59 = vld [vmem:[#allocation8 + $0x7e8] sm:$0xff]  ;;  %v481_v0 = vld [vmem:[#allocation8 + $0x7d8] sm:$0xff] }
  0xeb   :  { %1640 = vmatpush1.bf16.msra.mxu0 %v1639_v14  ;;  %v1659_v14 = vpack.c.bf16 %v442_v4, %v438_v3  ;;  %v485_v1 = vld [vmem:[#allocation8 + $0x7f8] sm:$0xff]  ;;  %v478_v3 = vld [vmem:[#allocation8 + $0x7c0] sm:$0xff] }
  0xec   :  { %1642 = vmatprep.subr.bf16.mxu0 %v1641_v17  ;;  %v1661_v17 = vpack.c.bf16 %v451_v7, %v447_v6  ;;  %v482_v4 = vld [vmem:[#allocation8 + $0x7e0] sm:$0xff]  ;;  %v815_v6 = vld [vmem:[#allocation10 + $0x8] sm:$0xff]  ;;  %v817_v7 = vld [vmem:[#allocation10 + $0x18] sm:$0xff] }
  0xed   :  { %1768 = vmatpush1.bf16.msra.mxu1 %v1767_v21  ;;  %v1787_v21 = vpack.c.bf16 %v444_v13, %v440_v12  ;;  %v480_v12 = vld [vmem:[#allocation8 + $0x7d0] sm:$0xff] }
  0xee   :  { %1770 = vmatprep.subr.bf16.mxu1 %v1769_v24  ;;  %v1789_v24 = vpack.c.bf16 %v453_v16, %v449_v15  ;;  %v484_v13 = vld [vmem:[#allocation8 + $0x7f0] sm:$0xff]  ;;  %v1109_v15 = vld [vmem:[#allocation11 + $0x8] sm:$0xff]  ;;  %v1111_v16 = vld [vmem:[#allocation11 + $0x18] sm:$0xff] }
  0xef   :  { %1644 = vmatpush1.bf16.msra.mxu0 %v1643_v27  ;;  %v1663_v27 = vpack.c.bf16 %v450_v19, %v446_v18  ;;  %v814_v18 = vld [vmem:[#allocation10] sm:$0xff]  ;;  %v816_v19 = vld [vmem:[#allocation10 + $0x10] sm:$0xff] }
  0xf0   :  { %1646 = vmatprep.subr.bf16.mxu0 %v1645_v30  ;;  %v1665_v30 = vpack.c.bf16 %v459_v23, %v455_v22  ;;  %v819_v22 = vld [vmem:[#allocation10 + $0x28] sm:$0xff]  ;;  %v821_v23 = vld [vmem:[#allocation10 + $0x38] sm:$0xff] }
  0xf1   :  { %1772 = vmatpush1.bf16.msra.mxu1 %v1771_v33  ;;  %v1791_v33 = vpack.c.bf16 %v452_v26, %v448_v25  ;;  %v1108_v25 = vld [vmem:[#allocation11] sm:$0xff]  ;;  %v1110_v26 = vld [vmem:[#allocation11 + $0x10] sm:$0xff] }
  0xf2   :  { %1774 = vmatprep.subr.bf16.mxu1 %v1773_v36  ;;  %v1793_v36 = vpack.c.bf16 %v461_v29, %v457_v28  ;;  %v1811_v28 = vpack.c.bf16 %v816_v19, %v814_v18  ;;  %v1113_v29 = vld [vmem:[#allocation11 + $0x28] sm:$0xff]  ;;  %v1131_v18 = vld [vmem:[#allocation11 + $0xb8] sm:$0xff] }
  0xf3   :  { %1648 = vmatpush1.bf16.msra.mxu0 %v1647_v39  ;;  %v1667_v39 = vpack.c.bf16 %v458_v32, %v454_v31  ;;  %v221_v31 = vld [vmem:[#allocation5 + $0x38] sm:$0xff]  ;;  %v1813_v32 = vpack.c.bf16 %v821_v23, %v819_v22  ;;  %v836_v22 = vld [vmem:[#allocation10 + $0xb0] sm:$0xff]  ;;  %v839_v23 = vld [vmem:[#allocation10 + $0xc8] sm:$0xff] }
  0xf4   :  { %1650 = vmatprep.subr.bf16.mxu0 %v1649_v42  ;;  %v1669_v42 = vpack.c.bf16 %v467_v35, %v463_v34  ;;  %v820_v34 = vld [vmem:[#allocation10 + $0x30] sm:$0xff]  ;;  %v823_v35 = vld [vmem:[#allocation10 + $0x48] sm:$0xff] }
  0xf5   :  { %1776 = vmatpush1.bf16.msra.mxu1 %v1775_v45  ;;  %v1795_v45 = vpack.c.bf16 %v460_v38, %v456_v37  ;;  %v1939_v37 = vpack.c.bf16 %v1110_v26, %v1108_v25 }
  0xf6   :  { %1778 = vmatprep.subr.bf16.mxu1 %v1777_v48  ;;  %v1797_v48 = vpack.c.bf16 %v469_v41, %v465_v40  ;;  %v1114_v40 = vld [vmem:[#allocation11 + $0x30] sm:$0xff] }
  0xf7   :  { %1652 = vmatpush1.bf16.msra.mxu0 %v1651_v51  ;;  %v1671_v51 = vpack.c.bf16 %v466_v44, %v462_v43  ;;  %v2570_v41 = vld [vmem:[#allocation5 + $0x30] sm:$0xff]  ;;  %v1117_v43 = vld [vmem:[#allocation11 + $0x48] sm:$0xff]  ;;  %v1119_v44 = vld [vmem:[#allocation11 + $0x58] sm:$0xff] }
  0xf8   :  { %1654 = vmatprep.subr.bf16.mxu0 %v1653_v54  ;;  %v1673_v54 = vpack.c.bf16 %v475_v47, %v471_v46  ;;  %v822_v46 = vld [vmem:[#allocation10 + $0x40] sm:$0xff]  ;;  %v824_v47 = vld [vmem:[#allocation10 + $0x50] sm:$0xff] }
  0xf9   :  { %1780 = vmatpush1.bf16.msra.mxu1 %v1779_v57  ;;  %v1799_v57 = vpack.c.bf16 %v468_v50, %v464_v49  ;;  %v829_v49 = vld [vmem:[#allocation10 + $0x78] sm:$0xff] }
  0xfa   :  { %1782 = vmatprep.subr.bf16.mxu1 %v1781_v60  ;;  %v1801_v60 = vpack.c.bf16 %v477_v53, %v473_v52  ;;  %v1116_v52 = vld [vmem:[#allocation11 + $0x40] sm:$0xff]  ;;  %v1118_v53 = vld [vmem:[#allocation11 + $0x50] sm:$0xff] }
  0xfb   :  { %1656 = vmatpush1.bf16.msra.mxu0 %v1655_v63  ;;  %v1675_v63 = vpack.c.bf16 %v474_v56, %v470_v55  ;;  %v1121_v55 = vld [vmem:[#allocation11 + $0x68] sm:$0xff]  ;;  %v1123_v56 = vld [vmem:[#allocation11 + $0x78] sm:$0xff] }
  0xfc   :  { %1658 = vmatprep.subr.bf16.mxu0 %v1657_v2  ;;  %v1677_v2 = vpack.c.bf16 %v483_v59, %v479_v58  ;;  %v826_v58 = vld [vmem:[#allocation10 + $0x60] sm:$0xff]  ;;  %v828_v59 = vld [vmem:[#allocation10 + $0x70] sm:$0xff] }
  0xfd   :  { %1784 = vmatpush1.bf16.msra.mxu1 %v1783_v5  ;;  %v1803_v5 = vpack.c.bf16 %v476_v62, %v472_v61  ;;  %v833_v61 = vld [vmem:[#allocation10 + $0x98] sm:$0xff]  ;;  %v1947_v62 = vpack.c.bf16 %v1118_v53, %v1116_v52  ;;  %v1136_v52 = vld [vmem:[#allocation11 + $0xe0] sm:$0xff]  ;;  %v1138_v53 = vld [vmem:[#allocation11 + $0xf0] sm:$0xff] }
  0xfe   :  { %1786 = vmatprep.subr.bf16.mxu1 %v1785_v11  ;;  %v1805_v11 = vpack.c.bf16 %v485_v1, %v481_v0  ;;  %v1120_v0 = vld [vmem:[#allocation11 + $0x60] sm:$0xff]  ;;  %v1122_v1 = vld [vmem:[#allocation11 + $0x70] sm:$0xff] }
  0xff   :  { %1660 = vmatpush1.bf16.msra.mxu0 %v1659_v14  ;;  %v1679_v14 = vpack.c.bf16 %v482_v4, %v478_v3  ;;  %v1125_v3 = vld [vmem:[#allocation11 + $0x88] sm:$0xff]  ;;  %v1127_v4 = vld [vmem:[#allocation11 + $0x98] sm:$0xff] }
 0x100   :  { %1662 = vmatprep.subr.bf16.mxu0 %v1661_v17  ;;  %v1809_v17 = vpack.c.bf16 %v817_v7, %v815_v6  ;;  %v830_v6 = vld [vmem:[#allocation10 + $0x80] sm:$0xff]  ;;  %v832_v7 = vld [vmem:[#allocation10 + $0x90] sm:$0xff] }
 0x101   :  { %1788 = vmatpush1.bf16.msra.mxu1 %v1787_v21  ;;  %v1807_v21 = vpack.c.bf16 %v484_v13, %v480_v12  ;;  %v837_v12 = vld [vmem:[#allocation10 + $0xb8] sm:$0xff]  ;;  %v1951_v13 = vpack.c.bf16 %v1122_v1, %v1120_v0  ;;  %v1140_v0 = vld [vmem:[#allocation11 + $0x100] sm:$0xff]  ;;  %v1142_v1 = vld [vmem:[#allocation11 + $0x110] sm:$0xff] }
 0x102   :  { %1790 = vmatprep.subr.bf16.mxu1 %v1789_v24  ;;  %v1937_v24 = vpack.c.bf16 %v1111_v16, %v1109_v15  ;;  %v1124_v15 = vld [vmem:[#allocation11 + $0x80] sm:$0xff]  ;;  %v1827_v16 = vpack.c.bf16 %v832_v7, %v830_v6  ;;  %v852_v7 = vld [vmem:[#allocation10 + $0x130] sm:$0xff] }
 0x103   :  { %1664 = vmatpush1.bf16.msra.mxu0 %v1663_v27  ;;  %v216_v27 = vld [vmem:[#allocation5 + $0x10] sm:$0xff]  ;;  %v850_v6 = vld [vmem:[#allocation10 + $0x120] sm:$0xff] }
 0x104   :  { %1666 = vmatprep.subr.bf16.mxu0 %v1665_v30  ;;  %v1115_v30 = vld [vmem:[#allocation11 + $0x38] sm:$0xff] }
 0x105   :  { %1792 = vmatpush1.bf16.msra.mxu1 %v1791_v33  ;;  %v818_v33 = vld [vmem:[#allocation10 + $0x20] sm:$0xff]  ;;  %v1941_v38 = vpack.c.bf16 %v1115_v30, %v1113_v29  ;;  %v1133_v30 = vld [vmem:[#allocation11 + $0xc8] sm:$0xff] }
 0x106   :  { %1794 = vmatprep.subr.bf16.mxu1 %v1793_v36  ;;  %v825_v36 = vld [vmem:[#allocation10 + $0x58] sm:$0xff] }
 0x107   :  { %1668 = vmatpush1.bf16.msra.mxu0 %v1667_v39  ;;  %v1112_v39 = vld [vmem:[#allocation11 + $0x20] sm:$0xff] }
 0x108   :  { %1670 = vmatprep.subr.bf16.mxu0 %v1669_v42  ;;  %v1815_v42 = vpack.c.bf16 %v820_v34, %v818_v33  ;;  %v1943_v50 = vpack.c.bf16 %v1114_v40, %v1112_v39  ;;  %v838_v33 = vld [vmem:[#allocation10 + $0xc0] sm:$0xff]  ;;  %v840_v34 = vld [vmem:[#allocation10 + $0xd0] sm:$0xff] }
 0x109   :  { %1796 = vmatpush1.bf16.msra.mxu1 %v1795_v45  ;;  %v1817_v45 = vpack.c.bf16 %v825_v36, %v823_v35  ;;  %v843_v35 = vld [vmem:[#allocation10 + $0xe8] sm:$0xff]  ;;  %v845_v36 = vld [vmem:[#allocation10 + $0xf8] sm:$0xff]  ;;  %v1132_v39 = vld [vmem:[#allocation11 + $0xc0] sm:$0xff] }
 0x10a   :  { %1798 = vmatprep.subr.bf16.mxu1 %v1797_v48  ;;  %v827_v48 = vld [vmem:[#allocation10 + $0x68] sm:$0xff]  ;;  %v1134_v40 = vld [vmem:[#allocation11 + $0xd0] sm:$0xff] }
 0x10b   :  { %1672 = vmatpush1.bf16.msra.mxu0 %v1671_v51  ;;  %v1945_v51 = vpack.c.bf16 %v1119_v44, %v1117_v43  ;;  %v1137_v43 = vld [vmem:[#allocation11 + $0xe8] sm:$0xff]  ;;  %v1139_v44 = vld [vmem:[#allocation11 + $0xf8] sm:$0xff] }
 0x10c   :  { %1674 = vmatprep.subr.bf16.mxu0 %v1673_v54  ;;  %v1819_v54 = vpack.c.bf16 %v824_v47, %v822_v46  ;;  %v842_v46 = vld [vmem:[#allocation10 + $0xe0] sm:$0xff]  ;;  %v844_v47 = vld [vmem:[#allocation10 + $0xf0] sm:$0xff] }
 0x10d   :  { %1800 = vmatpush1.bf16.msra.mxu1 %v1799_v57  ;;  %v1821_v57 = vpack.c.bf16 %v829_v49, %v827_v48  ;;  %v847_v48 = vld [vmem:[#allocation10 + $0x108] sm:$0xff]  ;;  %v849_v49 = vld [vmem:[#allocation10 + $0x118] sm:$0xff] }
 0x10e   :  { %1802 = vmatprep.subr.bf16.mxu1 %v1801_v60  ;;  %v831_v60 = vld [vmem:[#allocation10 + $0x88] sm:$0xff] }
 0x10f   :  { %1676 = vmatpush1.bf16.msra.mxu0 %v1675_v63  ;;  %v1949_v63 = vpack.c.bf16 %v1123_v56, %v1121_v55  ;;  %v1141_v55 = vld [vmem:[#allocation11 + $0x108] sm:$0xff]  ;;  %v1143_v56 = vld [vmem:[#allocation11 + $0x118] sm:$0xff] }
 0x110   :  { %1678 = vmatprep.subr.bf16.mxu0 %v1677_v2  ;;  %v1823_v2 = vpack.c.bf16 %v828_v59, %v826_v58  ;;  %v846_v58 = vld [vmem:[#allocation10 + $0x100] sm:$0xff]  ;;  %v848_v59 = vld [vmem:[#allocation10 + $0x110] sm:$0xff] }
 0x111   :  { %1804 = vmatpush1.bf16.msra.mxu1 %v1803_v5  ;;  %v1825_v5 = vpack.c.bf16 %v833_v61, %v831_v60  ;;  %v851_v60 = vld [vmem:[#allocation10 + $0x128] sm:$0xff]  ;;  %v853_v61 = vld [vmem:[#allocation10 + $0x138] sm:$0xff] }
 0x112   :  { %1806 = vmatprep.subr.bf16.mxu1 %v1805_v11  ;;  %v835_v11 = vld [vmem:[#allocation10 + $0xa8] sm:$0xff] }
 0x113   :  { %1680 = vmatpush1.bf16.msra.mxu0 %v1679_v14  ;;  %v1953_v14 = vpack.c.bf16 %v1127_v4, %v1125_v3  ;;  %v1829_v19 = vpack.c.bf16 %v837_v12, %v835_v11  ;;  %v1145_v3 = vld [vmem:[#allocation11 + $0x128] sm:$0xff]  ;;  %v1147_v4 = vld [vmem:[#allocation11 + $0x138] sm:$0xff] }
 0x114   :  { %1810 = vmatprep.subr.bf16.mxu0 %v1809_v17  ;;  %v1129_v17 = vld [vmem:[#allocation11 + $0xa8] sm:$0xff]  ;;  %v857_v12 = vld [vmem:[#allocation10 + $0x158] sm:$0xff] }
 0x115   :  { %1808 = vmatpush1.bf16.msra.mxu1 %v1807_v21  ;;  %v834_v21 = vld [vmem:[#allocation10 + $0xa0] sm:$0xff]  ;;  %v1957_v26 = vpack.c.bf16 %v1131_v18, %v1129_v17  ;;  %v855_v11 = vld [vmem:[#allocation10 + $0x148] sm:$0xff]  ;;  %v1151_v18 = vld [vmem:[#allocation11 + $0x158] sm:$0xff] }
 0x116   :  { %628 = vmatmul.mubr.f32.vlgmr.msra.gmra.mrb[0].mxu0 %v216_v27  ;;  %1938 = vmatprep.subr.bf16.mxu1 %v1937_v24  ;;  %v841_v24 = vld [vmem:[#allocation10 + $0xd8] sm:$0xff]  ;;  %v1831_v29 = vpack.c.bf16 %v836_v22, %v834_v21  ;;  %v1149_v17 = vld [vmem:[#allocation11 + $0x148] sm:$0xff]  ;;  %v854_v21 = vld [vmem:[#allocation10 + $0x140] sm:$0xff] }
 0x117   :  { %1812 = vmatpush1.bf16.msra.mxu0 %v1811_v28  ;;  %633 = vmatprep.mubr.f32.mxu0 %v221_v31  ;;  %v1130_v28 = vld [vmem:[#allocation11 + $0xb0] sm:$0xff] }
 0x118   :  { %782 = vmatmul.mubr.f32.vlgmr.msra.gmra.mrb[0].mxu1 %v216_v27  ;;  %1814 = vmatprep.subr.bf16.mxu0 %v1813_v32  ;;  %v1128_v27 = vld [vmem:[#allocation11 + $0xa0] sm:$0xff]  ;;  %v1833_v32 = vpack.c.bf16 %v841_v24, %v839_v23  ;;  %v856_v22 = vld [vmem:[#allocation10 + $0x150] sm:$0xff]  ;;  %v859_v23 = vld [vmem:[#allocation10 + $0x168] sm:$0xff] }
 0x119   :  { %787 = vmatprep.mubr.f32.mxu1 %v221_v31  ;;  %1940 = vmatpush1.bf16.msra.mxu1 %v1939_v37  ;;  %v1135_v31 = vld [vmem:[#allocation11 + $0xd8] sm:$0xff]  ;;  %v1959_v37 = vpack.c.bf16 %v1130_v28, %v1128_v27  ;;  %v1148_v27 = vld [vmem:[#allocation11 + $0x140] sm:$0xff]  ;;  %v1150_v28 = vld [vmem:[#allocation11 + $0x150] sm:$0xff] }
 0x11a   :  { %634 = vmatmul.mubr.f32.gmra.mrb[2].mxu0 %v2570_v41  ;;  %1942 = vmatprep.subr.bf16.mxu1 %v1941_v38  ;;  %v1961_v38 = vpack.c.bf16 %v1135_v31, %v1133_v30  ;;  %v861_v24 = vld [vmem:[#allocation10 + $0x178] sm:$0xff]  ;;  %v1153_v30 = vld [vmem:[#allocation11 + $0x168] sm:$0xff] }
 0x11b   :  { %1816 = vmatpush1.bf16.msra.mxu0 %v1815_v42  ;;  %1006 = vmatprep.mubr.f32.mxu0 %v2554_v10  ;;  %v1835_v42 = vpack.c.bf16 %v840_v34, %v838_v33  ;;  %v1155_v31 = vld [vmem:[#allocation11 + $0x178] sm:$0xff]  ;;  %v858_v33 = vld [vmem:[#allocation10 + $0x160] sm:$0xff]  ;;  %v860_v34 = vld [vmem:[#allocation10 + $0x170] sm:$0xff] }
 0x11c   :  { %788 = vmatmul.mubr.f32.gmra.mrb[2].mxu1 %v2570_v41  ;;  %1818 = vmatprep.subr.bf16.mxu0 %v1817_v45  ;;  %v1837_v45 = vpack.c.bf16 %v845_v36, %v843_v35  ;;  %v863_v35 = vld [vmem:[#allocation10 + $0x188] sm:$0xff]  ;;  %v865_v36 = vld [vmem:[#allocation10 + $0x198] sm:$0xff] }
 0x11d   :  { %1944 = vmatpush1.bf16.msra.mxu1 %v1943_v50  ;;  %1300 = vmatprep.mubr.f32.mxu1 %v2554_v10  ;;  %v1126_v10 = vld [vmem:[#allocation11 + $0x90] sm:$0xff]  ;;  %v1963_v50 = vpack.c.bf16 %v1134_v40, %v1132_v39  ;;  %v1152_v39 = vld [vmem:[#allocation11 + $0x160] sm:$0xff] }
 0x11e   :  { %1946 = vmatprep.subr.bf16.mxu1 %v1945_v51  ;;  %v1955_v25 = vpack.c.bf16 %v1126_v10, %v1124_v15  ;;  %v1965_v51 = vpack.c.bf16 %v1139_v44, %v1137_v43  ;;  %v1144_v15 = vld [vmem:[#allocation11 + $0x120] sm:$0xff]  ;;  %v1146_v10 = vld [vmem:[#allocation11 + $0x130] sm:$0xff]  ;;  %v1157_v43 = vld [vmem:[#allocation11 + $0x188] sm:$0xff] }
 0x11f   :  { %1820 = vmatpush1.bf16.msra.mxu0 %v1819_v54  ;;  %v1839_v54 = vpack.c.bf16 %v844_v47, %v842_v46  ;;  %v1154_v40 = vld [vmem:[#allocation11 + $0x170] sm:$0xff]  ;;  %v1159_v44 = vld [vmem:[#allocation11 + $0x198] sm:$0xff]  ;;  %v862_v46 = vld [vmem:[#allocation10 + $0x180] sm:$0xff] }
 0x120   :  { %1822 = vmatprep.subr.bf16.mxu0 %v1821_v57  ;;  %v1841_v57 = vpack.c.bf16 %v849_v49, %v847_v48  ;;  %v864_v47 = vld [vmem:[#allocation10 + $0x190] sm:$0xff]  ;;  %v867_v48 = vld [vmem:[#allocation10 + $0x1a8] sm:$0xff]  ;;  %v869_v49 = vld [vmem:[#allocation10 + $0x1b8] sm:$0xff] }
 0x121   :  { %1948 = vmatpush1.bf16.msra.mxu1 %v1947_v62  ;;  %v1967_v62 = vpack.c.bf16 %v1138_v53, %v1136_v52  ;;  %v1156_v52 = vld [vmem:[#allocation11 + $0x180] sm:$0xff]  ;;  %v1158_v53 = vld [vmem:[#allocation11 + $0x190] sm:$0xff] }
 0x122   :  { %1950 = vmatprep.subr.bf16.mxu1 %v1949_v63  ;;  %v1969_v63 = vpack.c.bf16 %v1143_v56, %v1141_v55  ;;  %v1161_v55 = vld [vmem:[#allocation11 + $0x1a8] sm:$0xff]  ;;  %v1163_v56 = vld [vmem:[#allocation11 + $0x1b8] sm:$0xff] }
 0x123   :  { %1824 = vmatpush1.bf16.msra.mxu0 %v1823_v2  ;;  %v1843_v2 = vpack.c.bf16 %v848_v59, %v846_v58  ;;  %v866_v58 = vld [vmem:[#allocation10 + $0x1a0] sm:$0xff]  ;;  %v868_v59 = vld [vmem:[#allocation10 + $0x1b0] sm:$0xff] }
 0x124   :  { %1826 = vmatprep.subr.bf16.mxu0 %v1825_v5  ;;  %v1845_v5 = vpack.c.bf16 %v853_v61, %v851_v60  ;;  %v871_v60 = vld [vmem:[#allocation10 + $0x1c8] sm:$0xff]  ;;  %v873_v61 = vld [vmem:[#allocation10 + $0x1d8] sm:$0xff] }
 0x125   :  { %1952 = vmatpush1.bf16.msra.mxu1 %v1951_v13  ;;  %v1971_v13 = vpack.c.bf16 %v1142_v1, %v1140_v0  ;;  %v1160_v0 = vld [vmem:[#allocation11 + $0x1a0] sm:$0xff]  ;;  %v1162_v1 = vld [vmem:[#allocation11 + $0x1b0] sm:$0xff] }
 0x126   :  { %1954 = vmatprep.subr.bf16.mxu1 %v1953_v14  ;;  %v1973_v14 = vpack.c.bf16 %v1147_v4, %v1145_v3  ;;  %v1165_v3 = vld [vmem:[#allocation11 + $0x1c8] sm:$0xff]  ;;  %v1167_v4 = vld [vmem:[#allocation11 + $0x1d8] sm:$0xff] }
 0x127   :  { %1828 = vmatpush1.bf16.msra.mxu0 %v1827_v16  ;;  %v1847_v16 = vpack.c.bf16 %v852_v7, %v850_v6  ;;  %v870_v6 = vld [vmem:[#allocation10 + $0x1c0] sm:$0xff]  ;;  %v872_v7 = vld [vmem:[#allocation10 + $0x1d0] sm:$0xff] }
 0x128   :  { %1830 = vmatprep.subr.bf16.mxu0 %v1829_v19  ;;  %v1849_v19 = vpack.c.bf16 %v857_v12, %v855_v11  ;;  %v875_v11 = vld [vmem:[#allocation10 + $0x1e8] sm:$0xff]  ;;  %v877_v12 = vld [vmem:[#allocation10 + $0x1f8] sm:$0xff] }
 0x129   :  { %1956 = vmatpush1.bf16.msra.mxu1 %v1955_v25  ;;  %v1975_v25 = vpack.c.bf16 %v1146_v10, %v1144_v15  ;;  %v1164_v15 = vld [vmem:[#allocation11 + $0x1c0] sm:$0xff]  ;;  %v1166_v10 = vld [vmem:[#allocation11 + $0x1d0] sm:$0xff] }
 0x12a   :  { %1958 = vmatprep.subr.bf16.mxu1 %v1957_v26  ;;  %v1977_v26 = vpack.c.bf16 %v1151_v18, %v1149_v17  ;;  %v1169_v17 = vld [vmem:[#allocation11 + $0x1e8] sm:$0xff]  ;;  %v1171_v18 = vld [vmem:[#allocation11 + $0x1f8] sm:$0xff] }
 0x12b   :  { %1832 = vmatpush1.bf16.msra.mxu0 %v1831_v29  ;;  %v1851_v29 = vpack.c.bf16 %v856_v22, %v854_v21  ;;  %v874_v21 = vld [vmem:[#allocation10 + $0x1e0] sm:$0xff]  ;;  %v876_v22 = vld [vmem:[#allocation10 + $0x1f0] sm:$0xff] }
 0x12c   :  { %1834 = vmatprep.subr.bf16.mxu0 %v1833_v32  ;;  %v1853_v32 = vpack.c.bf16 %v861_v24, %v859_v23  ;;  %v879_v23 = vld [vmem:[#allocation10 + $0x208] sm:$0xff]  ;;  %v881_v24 = vld [vmem:[#allocation10 + $0x218] sm:$0xff] }
 0x12d   :  { %1960 = vmatpush1.bf16.msra.mxu1 %v1959_v37  ;;  %v1979_v37 = vpack.c.bf16 %v1150_v28, %v1148_v27  ;;  %v1168_v27 = vld [vmem:[#allocation11 + $0x1e0] sm:$0xff]  ;;  %v1170_v28 = vld [vmem:[#allocation11 + $0x1f0] sm:$0xff] }
 0x12e   :  { %1962 = vmatprep.subr.bf16.mxu1 %v1961_v38  ;;  %v1981_v38 = vpack.c.bf16 %v1155_v31, %v1153_v30  ;;  %v1173_v30 = vld [vmem:[#allocation11 + $0x208] sm:$0xff]  ;;  %v1175_v31 = vld [vmem:[#allocation11 + $0x218] sm:$0xff] }
 0x12f   :  { %1836 = vmatpush1.bf16.msra.mxu0 %v1835_v42  ;;  %v1855_v42 = vpack.c.bf16 %v860_v34, %v858_v33  ;;  %v878_v33 = vld [vmem:[#allocation10 + $0x200] sm:$0xff]  ;;  %v880_v34 = vld [vmem:[#allocation10 + $0x210] sm:$0xff] }
 0x130   :  { %1838 = vmatprep.subr.bf16.mxu0 %v1837_v45  ;;  %v1857_v45 = vpack.c.bf16 %v865_v36, %v863_v35  ;;  %v883_v35 = vld [vmem:[#allocation10 + $0x228] sm:$0xff]  ;;  %v885_v36 = vld [vmem:[#allocation10 + $0x238] sm:$0xff] }
 0x131   :  { %1964 = vmatpush1.bf16.msra.mxu1 %v1963_v50  ;;  %v1983_v50 = vpack.c.bf16 %v1154_v40, %v1152_v39  ;;  %v1172_v39 = vld [vmem:[#allocation11 + $0x200] sm:$0xff]  ;;  %v1174_v40 = vld [vmem:[#allocation11 + $0x210] sm:$0xff] }
 0x132   :  { %1966 = vmatprep.subr.bf16.mxu1 %v1965_v51  ;;  %v1985_v51 = vpack.c.bf16 %v1159_v44, %v1157_v43  ;;  %v1177_v43 = vld [vmem:[#allocation11 + $0x228] sm:$0xff]  ;;  %v1179_v44 = vld [vmem:[#allocation11 + $0x238] sm:$0xff] }
 0x133   :  { %1840 = vmatpush1.bf16.msra.mxu0 %v1839_v54  ;;  %v1859_v54 = vpack.c.bf16 %v864_v47, %v862_v46  ;;  %v882_v46 = vld [vmem:[#allocation10 + $0x220] sm:$0xff]  ;;  %v884_v47 = vld [vmem:[#allocation10 + $0x230] sm:$0xff] }
 0x134   :  { %1842 = vmatprep.subr.bf16.mxu0 %v1841_v57  ;;  %v1861_v57 = vpack.c.bf16 %v869_v49, %v867_v48  ;;  %v887_v48 = vld [vmem:[#allocation10 + $0x248] sm:$0xff]  ;;  %v889_v49 = vld [vmem:[#allocation10 + $0x258] sm:$0xff] }
 0x135   :  { %1968 = vmatpush1.bf16.msra.mxu1 %v1967_v62  ;;  %v1987_v62 = vpack.c.bf16 %v1158_v53, %v1156_v52  ;;  %v2005_v52 = vpack.c.bf16 %v1179_v44, %v1177_v43  ;;  %v1176_v53 = vld [vmem:[#allocation11 + $0x220] sm:$0xff] }
 0x136   :  { %1970 = vmatprep.subr.bf16.mxu1 %v1969_v63  ;;  %v1989_v63 = vpack.c.bf16 %v1163_v56, %v1161_v55  ;;  %v1879_v55 = vpack.c.bf16 %v884_v47, %v882_v46  ;;  %v1181_v56 = vld [vmem:[#allocation11 + $0x248] sm:$0xff]  ;;  %v902_v44 = vld [vmem:[#allocation10 + $0x2c0] sm:$0xff]  ;;  %v909_v47 = vld [vmem:[#allocation10 + $0x2f8] sm:$0xff] }
 0x137   :  { %1844 = vmatpush1.bf16.msra.mxu0 %v1843_v2  ;;  %v1863_v2 = vpack.c.bf16 %v868_v59, %v866_v58  ;;  %v1881_v58 = vpack.c.bf16 %v889_v49, %v887_v48  ;;  %v886_v59 = vld [vmem:[#allocation10 + $0x240] sm:$0xff]  ;;  %v907_v46 = vld [vmem:[#allocation10 + $0x2e8] sm:$0xff] }
 0x138   :  { %1846 = vmatprep.subr.bf16.mxu0 %v1845_v5  ;;  %v1865_v5 = vpack.c.bf16 %v873_v61, %v871_v60  ;;  %v888_v60 = vld [vmem:[#allocation10 + $0x250] sm:$0xff]  ;;  %v891_v61 = vld [vmem:[#allocation10 + $0x268] sm:$0xff] }
 0x139   :  { %1972 = vmatpush1.bf16.msra.mxu1 %v1971_v13  ;;  %v1991_v13 = vpack.c.bf16 %v1162_v1, %v1160_v0  ;;  %v1180_v1 = vld [vmem:[#allocation11 + $0x240] sm:$0xff] }
 0x13a   :  { %1974 = vmatprep.subr.bf16.mxu1 %v1973_v14  ;;  %v1993_v14 = vpack.c.bf16 %v1167_v4, %v1165_v3  ;;  %v1883_v3 = vpack.c.bf16 %v888_v60, %v886_v59  ;;  %v1185_v4 = vld [vmem:[#allocation11 + $0x268] sm:$0xff]  ;;  %v913_v59 = vld [vmem:[#allocation10 + $0x318] sm:$0xff] }
 0x13b   :  { %1848 = vmatpush1.bf16.msra.mxu0 %v1847_v16  ;;  %v1867_v16 = vpack.c.bf16 %v872_v7, %v870_v6  ;;  %v890_v7 = vld [vmem:[#allocation10 + $0x260] sm:$0xff] }
 0x13c   :  { %1850 = vmatprep.subr.bf16.mxu0 %v1849_v19  ;;  %v1869_v19 = vpack.c.bf16 %v877_v12, %v875_v11  ;;  %v892_v11 = vld [vmem:[#allocation10 + $0x270] sm:$0xff]  ;;  %v895_v12 = vld [vmem:[#allocation10 + $0x288] sm:$0xff] }
 0x13d   :  { %1976 = vmatpush1.bf16.msra.mxu1 %v1975_v25  ;;  %v1995_v25 = vpack.c.bf16 %v1166_v10, %v1164_v15  ;;  %v1184_v15 = vld [vmem:[#allocation11 + $0x260] sm:$0xff]  ;;  %v1186_v10 = vld [vmem:[#allocation11 + $0x270] sm:$0xff] }
 0x13e   :  { %1978 = vmatprep.subr.bf16.mxu1 %v1977_v26  ;;  %v1997_v26 = vpack.c.bf16 %v1171_v18, %v1169_v17  ;;  %v1189_v17 = vld [vmem:[#allocation11 + $0x288] sm:$0xff]  ;;  %v1191_v18 = vld [vmem:[#allocation11 + $0x298] sm:$0xff] }
 0x13f   :  { %1852 = vmatpush1.bf16.msra.mxu0 %v1851_v29  ;;  %v1871_v29 = vpack.c.bf16 %v876_v22, %v874_v21  ;;  %v894_v21 = vld [vmem:[#allocation10 + $0x280] sm:$0xff]  ;;  %v896_v22 = vld [vmem:[#allocation10 + $0x290] sm:$0xff] }
 0x140   :  { %1854 = vmatprep.subr.bf16.mxu0 %v1853_v32  ;;  %v1873_v32 = vpack.c.bf16 %v881_v24, %v879_v23  ;;  %v899_v23 = vld [vmem:[#allocation10 + $0x2a8] sm:$0xff]  ;;  %v2015_v24 = vpack.c.bf16 %v1186_v10, %v1184_v15  ;;  %v1211_v10 = vld [vmem:[#allocation11 + $0x338] sm:$0xff] }
 0x141   :  { %1980 = vmatpush1.bf16.msra.mxu1 %v1979_v37  ;;  %v1999_v37 = vpack.c.bf16 %v1170_v28, %v1168_v27  ;;  %v1891_v27 = vpack.c.bf16 %v896_v22, %v894_v21  ;;  %v1193_v28 = vld [vmem:[#allocation11 + $0x2a8] sm:$0xff]  ;;  %v921_v21 = vld [vmem:[#allocation10 + $0x358] sm:$0xff] }
 0x142   :  { %1982 = vmatprep.subr.bf16.mxu1 %v1981_v38  ;;  %v2001_v38 = vpack.c.bf16 %v1175_v31, %v1173_v30  ;;  %v898_v31 = vld [vmem:[#allocation10 + $0x2a0] sm:$0xff]  ;;  %v1209_v15 = vld [vmem:[#allocation11 + $0x328] sm:$0xff] }
 0x143   :  { %1856 = vmatpush1.bf16.msra.mxu0 %v1855_v42  ;;  %v1875_v42 = vpack.c.bf16 %v880_v34, %v878_v33  ;;  %v903_v33 = vld [vmem:[#allocation10 + $0x2c8] sm:$0xff]  ;;  %v905_v34 = vld [vmem:[#allocation10 + $0x2d8] sm:$0xff] }
 0x144   :  { %1858 = vmatprep.subr.bf16.mxu0 %v1857_v45  ;;  %v1877_v45 = vpack.c.bf16 %v885_v36, %v883_v35  ;;  %v1897_v43 = vpack.c.bf16 %v905_v34, %v903_v33  ;;  %v1212_v34 = vld [vmem:[#allocation11 + $0x340] sm:$0xff] }
 0x145   :  { %1984 = vmatpush1.bf16.msra.mxu1 %v1983_v50  ;;  %v2003_v50 = vpack.c.bf16 %v1174_v40, %v1172_v39  ;;  %v1197_v40 = vld [vmem:[#allocation11 + $0x2c8] sm:$0xff] }
 0x146   :  { %1986 = vmatprep.subr.bf16.mxu1 %v1985_v51  ;;  %v2099_v51 = vld [vmem:[#allocation5] sm:$0xff] }
 0x147   :  { %1860 = vmatpush1.bf16.msra.mxu0 %v1859_v54  ;;  %v1178_v54 = vld [vmem:[#allocation11 + $0x230] sm:$0xff] }
 0x148   :  { %1862 = vmatprep.subr.bf16.mxu0 %v1861_v57  ;;  %v1183_v57 = vld [vmem:[#allocation11 + $0x258] sm:$0xff] }
 0x149   :  { %1988 = vmatpush1.bf16.msra.mxu1 %v1987_v62  ;;  %v893_v62 = vld [vmem:[#allocation10 + $0x278] sm:$0xff]  ;;  %v2009_v0 = vpack.c.bf16 %v1183_v57, %v1181_v56  ;;  %v906_v56 = vld [vmem:[#allocation10 + $0x2e0] sm:$0xff]  ;;  %v908_v57 = vld [vmem:[#allocation10 + $0x2f0] sm:$0xff] }
 0x14a   :  { %1990 = vmatprep.subr.bf16.mxu1 %v1989_v63  ;;  %v2007_v63 = vpack.c.bf16 %v1178_v54, %v1176_v53  ;;  %v1885_v6 = vpack.c.bf16 %v893_v62, %v891_v61  ;;  %v1201_v53 = vld [vmem:[#allocation11 + $0x2e8] sm:$0xff]  ;;  %v1203_v54 = vld [vmem:[#allocation11 + $0x2f8] sm:$0xff]  ;;  %v1200_v62 = vld [vmem:[#allocation11 + $0x2e0] sm:$0xff] }
 0x14b   :  { %1864 = vmatpush1.bf16.msra.mxu0 %v1863_v2  ;;  %v1182_v2 = vld [vmem:[#allocation11 + $0x250] sm:$0xff]  ;;  %v2029_v61 = vpack.c.bf16 %v1203_v54, %v1201_v53  ;;  %v926_v53 = vld [vmem:[#allocation10 + $0x380] sm:$0xff] }
 0x14c   :  { %1866 = vmatprep.subr.bf16.mxu0 %v1865_v5  ;;  %v1187_v5 = vld [vmem:[#allocation11 + $0x278] sm:$0xff]  ;;  %v928_v54 = vld [vmem:[#allocation10 + $0x390] sm:$0xff] }
 0x14d   :  { %1992 = vmatpush1.bf16.msra.mxu1 %v1991_v13  ;;  %v2011_v13 = vpack.c.bf16 %v1182_v2, %v1180_v1  ;;  %v1205_v1 = vld [vmem:[#allocation11 + $0x308] sm:$0xff]  ;;  %v1207_v2 = vld [vmem:[#allocation11 + $0x318] sm:$0xff] }
 0x14e   :  { %1994 = vmatprep.subr.bf16.mxu1 %v1993_v14  ;;  %v2013_v14 = vpack.c.bf16 %v1187_v5, %v1185_v4  ;;  %v910_v4 = vld [vmem:[#allocation10 + $0x300] sm:$0xff]  ;;  %v912_v5 = vld [vmem:[#allocation10 + $0x310] sm:$0xff] }
 0x14f   :  { %1868 = vmatpush1.bf16.msra.mxu0 %v1867_v16  ;;  %v1887_v16 = vpack.c.bf16 %v892_v11, %v890_v7  ;;  %v917_v7 = vld [vmem:[#allocation10 + $0x338] sm:$0xff] }
 0x150   :  { %1870 = vmatprep.subr.bf16.mxu0 %v1869_v19 }
 0x151   :  { %1996 = vmatpush1.bf16.msra.mxu1 %v1995_v25  ;;  %v2017_v25 = vpack.c.bf16 %v1191_v18, %v1189_v17  ;;  %v914_v17 = vld [vmem:[#allocation10 + $0x320] sm:$0xff]  ;;  %v916_v18 = vld [vmem:[#allocation10 + $0x330] sm:$0xff] }
 0x152   :  { %1998 = vmatprep.subr.bf16.mxu1 %v1997_v26  ;;  %v1188_v26 = vld [vmem:[#allocation11 + $0x280] sm:$0xff] }
 0x153   :  { %1872 = vmatpush1.bf16.msra.mxu0 %v1871_v29  ;;  %v1195_v29 = vld [vmem:[#allocation11 + $0x2b8] sm:$0xff] }
 0x154   :  { %1874 = vmatprep.subr.bf16.mxu0 %v1873_v32  ;;  %v900_v32 = vld [vmem:[#allocation10 + $0x2b0] sm:$0xff]  ;;  %v2021_v36 = vpack.c.bf16 %v1195_v29, %v1193_v28  ;;  %v918_v28 = vld [vmem:[#allocation10 + $0x340] sm:$0xff] }
 0x155   :  { %2000 = vmatpush1.bf16.msra.mxu1 %v1999_v37  ;;  %v1192_v37 = vld [vmem:[#allocation11 + $0x2a0] sm:$0xff]  ;;  %v1895_v39 = vpack.c.bf16 %v900_v32, %v898_v31  ;;  %v920_v29 = vld [vmem:[#allocation10 + $0x350] sm:$0xff]  ;;  %v925_v31 = vld [vmem:[#allocation10 + $0x378] sm:$0xff] }
 0x156   :  { %1007 = vmatmul.mubr.f32.vlgmr.msra.gmra.mrb[4].mxu0 %v2099_v51  ;;  %2002 = vmatprep.subr.bf16.mxu1 %v2001_v38  ;;  %v1194_v38 = vld [vmem:[#allocation11 + $0x2b0] sm:$0xff] }
 0x157   :  { %1876 = vmatpush1.bf16.msra.mxu0 %v1875_v42  ;;  %1012 = vmatprep.mubr.f32.mxu0 %v2558_v8  ;;  %v1199_v42 = vld [vmem:[#allocation11 + $0x2d8] sm:$0xff]  ;;  %v2023_v48 = vpack.c.bf16 %v1194_v38, %v1192_v37  ;;  %v1217_v37 = vld [vmem:[#allocation11 + $0x368] sm:$0xff] }
 0x158   :  { %1878 = vmatprep.subr.bf16.mxu0 %v1877_v45  ;;  %1301 = vmatmul.mubr.f32.vlgmr.msra.gmra.mrb[4].mxu1 %v2099_v51  ;;  %v904_v45 = vld [vmem:[#allocation10 + $0x2d0] sm:$0xff]  ;;  %v2025_v49 = vpack.c.bf16 %v1199_v42, %v1197_v40  ;;  %v1219_v38 = vld [vmem:[#allocation11 + $0x378] sm:$0xff]  ;;  %v922_v40 = vld [vmem:[#allocation10 + $0x360] sm:$0xff] }
 0x159   :  { %2004 = vmatpush1.bf16.msra.mxu1 %v2003_v50  ;;  %1306 = vmatprep.mubr.f32.mxu1 %v2558_v8  ;;  %v897_v8 = vld [vmem:[#allocation10 + $0x298] sm:$0xff]  ;;  %v1196_v50 = vld [vmem:[#allocation11 + $0x2c0] sm:$0xff]  ;;  %v1198_v51 = vld [vmem:[#allocation11 + $0x2d0] sm:$0xff] }
 0x15a   :  { %1013 = vmatmul.mubr.f32.gmra.mrb[6].mxu0 %v2560_v9  ;;  %2006 = vmatprep.subr.bf16.mxu1 %v2005_v52  ;;  %v1889_v19 = vpack.c.bf16 %v897_v8, %v895_v12  ;;  %v1899_v52 = vpack.c.bf16 %v904_v45, %v902_v44  ;;  %v2027_v60 = vpack.c.bf16 %v1198_v51, %v1196_v50  ;;  %v1204_v8 = vld [vmem:[#allocation11 + $0x300] sm:$0xff]  ;;  %v924_v42 = vld [vmem:[#allocation10 + $0x370] sm:$0xff]  ;;  %v929_v44 = vld [vmem:[#allocation10 + $0x398] sm:$0xff] }
 0x15b   :  { %1880 = vmatpush1.bf16.msra.mxu0 %v1879_v55  ;;  %1083 = vmatprep.mubr.f32.mxu0 %v2565_v20  ;;  %v1901_v55 = vpack.c.bf16 %v909_v47, %v907_v46  ;;  %v2033_v12 = vpack.c.bf16 %v1207_v2, %v1205_v1  ;;  %v2045_v46 = vpack.c.bf16 %v1219_v38, %v1217_v37  ;;  %v1216_v47 = vld [vmem:[#allocation11 + $0x360] sm:$0xff]  ;;  %v1221_v50 = vld [vmem:[#allocation11 + $0x388] sm:$0xff]  ;;  %v1223_v51 = vld [vmem:[#allocation11 + $0x398] sm:$0xff] }
 0x15c   :  { %1882 = vmatprep.subr.bf16.mxu0 %v1881_v58  ;;  %1307 = vmatmul.mubr.f32.gmra.mrb[6].mxu1 %v2560_v9  ;;  %v901_v9 = vld [vmem:[#allocation10 + $0x2b8] sm:$0xff]  ;;  %v911_v58 = vld [vmem:[#allocation10 + $0x308] sm:$0xff]  ;;  %v930_v1 = vld [vmem:[#allocation10 + $0x3a0] sm:$0xff] }
 0x15d   :  { %2008 = vmatpush1.bf16.msra.mxu1 %v2007_v63  ;;  %1377 = vmatprep.mubr.f32.mxu1 %v2565_v20  ;;  %v1190_v20 = vld [vmem:[#allocation11 + $0x290] sm:$0xff]  ;;  %v1893_v30 = vpack.c.bf16 %v901_v9, %v899_v23  ;;  %v2037_v23 = vpack.c.bf16 %v1211_v10, %v1209_v15  ;;  %v1208_v9 = vld [vmem:[#allocation11 + $0x320] sm:$0xff] }
 0x15e   :  { %2010 = vmatprep.subr.bf16.mxu1 %v2009_v0  ;;  %v2019_v35 = vpack.c.bf16 %v1190_v20, %v1188_v26  ;;  %v1202_v63 = vld [vmem:[#allocation11 + $0x2f0] sm:$0xff]  ;;  %v1903_v0 = vpack.c.bf16 %v908_v57, %v906_v56  ;;  %v1213_v26 = vld [vmem:[#allocation11 + $0x348] sm:$0xff]  ;;  %v1215_v20 = vld [vmem:[#allocation11 + $0x358] sm:$0xff] }
 0x15f   :  { %1884 = vmatpush1.bf16.msra.mxu0 %v1883_v3  ;;  %v1905_v3 = vpack.c.bf16 %v913_v59, %v911_v58  ;;  %v2031_v11 = vpack.c.bf16 %v1202_v63, %v1200_v62  ;;  %v2041_v33 = vpack.c.bf16 %v1215_v20, %v1213_v26  ;;  %v933_v56 = vld [vmem:[#allocation10 + $0x3b8] sm:$0xff]  ;;  %v2049_v58 = vpack.c.bf16 %v1223_v51, %v1221_v50  ;;  %v1220_v59 = vld [vmem:[#allocation11 + $0x380] sm:$0xff]  ;;  %v1225_v62 = vld [vmem:[#allocation11 + $0x3a8] sm:$0xff] }
 0x160   :  { %1886 = vmatprep.subr.bf16.mxu0 %v1885_v6  ;;  %v915_v6 = vld [vmem:[#allocation10 + $0x328] sm:$0xff]  ;;  %v1227_v63 = vld [vmem:[#allocation11 + $0x3b8] sm:$0xff]  ;;  %v932_v2 = vld [vmem:[#allocation10 + $0x3b0] sm:$0xff] }
 0x161   :  { %2012 = vmatpush1.bf16.msra.mxu1 %v2011_v13  ;;  %v1206_v13 = vld [vmem:[#allocation11 + $0x310] sm:$0xff]  ;;  %v934_v15 = vld [vmem:[#allocation10 + $0x3c0] sm:$0xff] }
 0x162   :  { %2014 = vmatprep.subr.bf16.mxu1 %v2013_v14  ;;  %v1907_v14 = vpack.c.bf16 %v912_v5, %v910_v4  ;;  %v2035_v22 = vpack.c.bf16 %v1206_v13, %v1204_v8  ;;  %v937_v4 = vld [vmem:[#allocation10 + $0x3d8] sm:$0xff]  ;;  %v1229_v8 = vld [vmem:[#allocation11 + $0x3c8] sm:$0xff]  ;;  %v936_v10 = vld [vmem:[#allocation10 + $0x3d0] sm:$0xff] }
 0x163   :  { %1888 = vmatpush1.bf16.msra.mxu0 %v1887_v16  ;;  %v1909_v16 = vpack.c.bf16 %v917_v7, %v915_v6  ;;  %v2053_v6 = vpack.c.bf16 %v1227_v63, %v1225_v62  ;;  %v1224_v7 = vld [vmem:[#allocation11 + $0x3a0] sm:$0xff]  ;;  %v1231_v13 = vld [vmem:[#allocation11 + $0x3d8] sm:$0xff]  ;;  %v940_v20 = vld [vmem:[#allocation10 + $0x3f0] sm:$0xff] }
 0x164   :  { %1890 = vmatprep.subr.bf16.mxu0 %v1889_v19  ;;  %v919_v19 = vld [vmem:[#allocation10 + $0x348] sm:$0xff]  ;;  %v938_v26 = vld [vmem:[#allocation10 + $0x3e0] sm:$0xff] }
 0x165   :  { %2016 = vmatpush1.bf16.msra.mxu1 %v2015_v24  ;;  %v1210_v24 = vld [vmem:[#allocation11 + $0x330] sm:$0xff]  ;;  %v152_v38 = vld [vmem:[#allocation13] sm:$0xf]  ;;  %v2599_v63 = vld [vmem:[#allocation16] sm:$0xff] }
 0x166   :  { %2018 = vmatprep.subr.bf16.mxu1 %v2017_v25  ;;  %v1911_v25 = vpack.c.bf16 %v916_v18, %v914_v17  ;;  %v2039_v32 = vpack.c.bf16 %v1210_v24, %v1208_v9  ;;  %v941_v17 = vld [vmem:[#allocation10 + $0x3f8] sm:$0xff]  ;;  %v1233_v9 = vld [vmem:[#allocation11 + $0x3e8] sm:$0xff]  ;;  %v2597_v62 = vld [vmem:[%s2709_s7] sm:$0xff] }
 0x167   :  { %1892 = vmatpush1.bf16.msra.mxu0 %v1891_v27  ;;  %v1913_v27 = vpack.c.bf16 %v921_v21, %v919_v19  ;;  %v2057_v19 = vpack.c.bf16 %v1231_v13, %v1229_v8  ;;  %v1228_v21 = vld [vmem:[#allocation11 + $0x3c0] sm:$0xff]  ;;  %v1235_v24 = vld [vmem:[#allocation11 + $0x3f8] sm:$0xff] }
 0x168   :  { %1894 = vmatprep.subr.bf16.mxu0 %v1893_v30  ;;  %v923_v30 = vld [vmem:[#allocation10 + $0x368] sm:$0xff] }
 0x169   :  { %2020 = vmatpush1.bf16.msra.mxu1 %v2019_v35  ;;  %v1214_v35 = vld [vmem:[#allocation11 + $0x350] sm:$0xff] }
 0x16a   :  { %2022 = vmatprep.subr.bf16.mxu1 %v2021_v36  ;;  %v1915_v36 = vpack.c.bf16 %v920_v29, %v918_v28  ;;  %v2043_v45 = vpack.c.bf16 %v1214_v35, %v1212_v34  ;;  %v2061_v28 = vpack.c.bf16 %v1235_v24, %v1233_v9  ;;  %v1232_v29 = vld [vmem:[#allocation11 + $0x3e0] sm:$0xff]  ;;  %v2101_v34 = vld [vmem:[#allocation5 + $0x38] sm:$0xff]  ;;  %v154_v35 = vlaneseq }
 0x16b   :  { %1896 = vmatpush1.bf16.msra.mxu0 %v1895_v39  ;;  %v1917_v39 = vpack.c.bf16 %v925_v31, %v923_v30  ;;  %v1234_v30 = vld [vmem:[#allocation11 + $0x3f0] sm:$0xff]  ;;  %v1935_v31 = vpack.c.bf16 %v940_v20, %v938_v26 }
 0x16c   :  { %1898 = vmatprep.subr.bf16.mxu0 %v1897_v43  ;;  %v927_v43 = vld [vmem:[#allocation10 + $0x388] sm:$0xff] }
 0x16d   :  { %2024 = vmatpush1.bf16.msra.mxu1 %v2023_v48  ;;  %v1218_v48 = vld [vmem:[#allocation11 + $0x370] sm:$0xff] }
 0x16e   :  { %2026 = vmatprep.subr.bf16.mxu1 %v2025_v49  ;;  %v1919_v49 = vpack.c.bf16 %v924_v42, %v922_v40  ;;  %v2047_v57 = vpack.c.bf16 %v1218_v48, %v1216_v47 }
 0x16f   :  { %1900 = vmatpush1.bf16.msra.mxu0 %v1899_v52  ;;  %v1921_v52 = vpack.c.bf16 %v929_v44, %v927_v43 }
 0x170   :  { %1902 = vmatprep.subr.bf16.mxu0 %v1901_v55  ;;  %v931_v55 = vld [vmem:[#allocation10 + $0x3a8] sm:$0xff] }
 0x171   :  { %2028 = vmatpush1.bf16.msra.mxu1 %v2027_v60  ;;  %v1222_v60 = vld [vmem:[#allocation11 + $0x390] sm:$0xff] }
 0x172   :  { %2030 = vmatprep.subr.bf16.mxu1 %v2029_v61  ;;  %v1923_v61 = vpack.c.bf16 %v928_v54, %v926_v53  ;;  %v2051_v5 = vpack.c.bf16 %v1222_v60, %v1220_v59 }
 0x173   :  { %1904 = vmatpush1.bf16.msra.mxu0 %v1903_v0  ;;  %v1925_v0 = vpack.c.bf16 %v933_v56, %v931_v55 }
 0x174   :  { %1906 = vmatprep.subr.bf16.mxu0 %v1905_v3  ;;  %v935_v3 = vld [vmem:[#allocation10 + $0x3c8] sm:$0xff] }
 0x175   :  { %2032 = vmatpush1.bf16.msra.mxu1 %v2031_v11  ;;  %v1226_v11 = vld [vmem:[#allocation11 + $0x3b0] sm:$0xff] }
 0x176   :  { %2034 = vmatprep.subr.bf16.mxu1 %v2033_v12  ;;  %v1927_v12 = vpack.c.bf16 %v932_v2, %v930_v1  ;;  %v2055_v18 = vpack.c.bf16 %v1226_v11, %v1224_v7 }
 0x177   :  { %1908 = vmatpush1.bf16.msra.mxu0 %v1907_v14  ;;  %v1929_v14 = vpack.c.bf16 %v937_v4, %v935_v3  ;;  %v2606_v3 = vld [vmem:[%s2709_s7 + $0x8] sm:$0xff] }
 0x178   :  { %1910 = vmatprep.subr.bf16.mxu0 %v1909_v16  ;;  %v939_v16 = vld [vmem:[#allocation10 + $0x3e8] sm:$0xff] }
 0x179   :  { %2036 = vmatpush1.bf16.msra.mxu1 %v2035_v22  ;;  %v1230_v22 = vld [vmem:[#allocation11 + $0x3d0] sm:$0xff] }
 0x17a   :  { %2038 = vmatprep.subr.bf16.mxu1 %v2037_v23  ;;  %v1931_v23 = vpack.c.bf16 %v936_v10, %v934_v15  ;;  %v2608_v4 = vld [vmem:[#allocation16 + $0x8] sm:$0xff] }
 0x17b   :  { %1912 = vmatpush1.bf16.msra.mxu0 %v1911_v25  ;;  %v1933_v25 = vpack.c.bf16 %v941_v17, %v939_v16  ;;  %v198_v16 = vld [vmem:[#allocation14] sm:$0x3] }
 0x17c   :  { %1914 = vmatprep.subr.bf16.mxu0 %v1913_v27  ;;  %v2059_v27 = vpack.c.bf16 %v1230_v22, %v1228_v21 }
 0x17d   :  { %2040 = vmatpush1.bf16.msra.mxu1 %v2039_v32  ;;  %v2063_v32 = vpack.c.bf16 %v1234_v30, %v1232_v29 }
 0x17e   :  { %2042 = vmatprep.subr.bf16.mxu1 %v2041_v33  ;;  %v2100_v33 = vld [vmem:[#allocation5 + $0x10] sm:$0xff] }
 0x17f   :  { %1916 = vmatpush1.bf16.msra.mxu0 %v1915_v36  ;;  %v155_v36 = vshrl.u32 %v154_v35, 7 }
 0x180   :  { %1918 = vmatprep.subr.bf16.mxu0 %v1917_v39 }
 0x181   :  { %2044 = vmatpush1.bf16.msra.mxu1 %v2043_v45  ;;  %v156_v37 = vsub.s32 0, %v155_v36  ;;  %v164_v39 = vsub.s32 2, %v155_v36  ;;  %v168_v40 = vsub.s32 3, %v155_v36  ;;  %v160_v47 = vsub.s32 1, %v155_v36 }
 0x182   :  { %2046 = vmatprep.subr.bf16.mxu1 %v2045_v46 }
 0x183   :  { %1920 = vmatpush1.bf16.msra.mxu0 %v1919_v49  ;;  %v157_v42 = vrot.slane %v152_v38, %v156_v37  ;;  %v165_v43 = vrot.slane %v152_v38, %v164_v39  ;;  %v169_v45 = vrot.slane %v152_v38, %v168_v40  ;;  %v161_v53 = vrot.slane %v152_v38, %v160_v47 }
 0x184   :  { %1922 = vmatprep.subr.bf16.mxu0 %v1921_v52 }
 0x185   :  { %2048 = vmatpush1.bf16.msra.mxu1 %v2047_v57 }
 0x186   :  { %2050 = vmatprep.subr.bf16.mxu1 %v2049_v58 }
 0x187   :  { %1924 = vmatpush1.bf16.msra.mxu0 %v1923_v61 }
 0x188   :  { %1926 = vmatprep.subr.bf16.mxu0 %v1925_v0 }
 0x189   :  { %2052 = vmatpush1.bf16.msra.mxu1 %v2051_v5 }
 0x18a   :  { %2054 = vmatprep.subr.bf16.mxu1 %v2053_v6 }
 0x18b   :  { %1928 = vmatpush1.bf16.msra.mxu0 %v1927_v12 }
 0x18c   :  { %1930 = vmatprep.subr.bf16.mxu0 %v1929_v14  ;;  %v182_v14 = vld [vmem:[%s2707_s5] sm:$0x3] }
 0x18d   :  { %2056 = vmatpush1.bf16.msra.mxu1 %v2055_v18  ;;  %v191_v21 = vrot.slane %v182_v14, %v160_v47 }
 0x18e   :  { %2058 = vmatprep.subr.bf16.mxu1 %v2057_v19  ;;  %v187_v19 = vrot.slane %v182_v14, %v156_v37 }
 0x18f   :  { %1932 = vmatpush1.bf16.msra.mxu0 %v1931_v23 }
 0x190   :  { %1934 = vmatprep.subr.bf16.mxu0 %v1933_v25  ;;  %v203_v25 = vrot.slane %v198_v16, %v156_v37 }
 0x191   :  { %2060 = vmatpush1.bf16.msra.mxu1 %v2059_v27 }
 0x192   :  { %2062 = vmatprep.subr.bf16.mxu1 %v2061_v28  ;;  %v207_v28 = vrot.slane %v198_v16, %v160_v47 }
 0x193   :  { %1936 = vmatpush1.bf16.msra.mxu0 %v1935_v31 }
 0x195   :  { %2064 = vmatpush1.bf16.msra.mxu1 %v2063_v32 }
 0x196   :  { %1084 = vmatmul.mubr.f32.vlgmr.msra.gmra.mrb[4].mxu0 %v2100_v33 }
 0x197   :  { %1089 = vmatprep.mubr.f32.mxu0 %v2101_v34 }
 0x198   :  { %1378 = vmatmul.mubr.f32.vlgmr.msra.gmra.mrb[4].mxu1 %v2100_v33 }
 0x199   :  { %1383 = vmatprep.mubr.f32.mxu1 %v2101_v34 }
 0x19a   :  { %1090 = vmatmul.mubr.f32.gmra.mrb[6].mxu0 %v2570_v41 }
 0x19c   :  { %1384 = vmatmul.mubr.f32.gmra.mrb[6].mxu1 %v2570_v41 }
 0x1e9   :  { %v629_v44 = vpop.f32.mrb[0].mxu0 }
 0x1ea   :  { %v794_v46 = vadd.f32 %v629_v44, %v157_v42  ;;  %v631_v48 = vpop.f32.mrb[1].mxu0 }
 0x1eb   :  { %v783_v49 = vpop.f32.mrb[0].mxu1  ;;  %v795_v60 = vadd.f32 %v631_v48, %v161_v53 }
 0x1ec   :  { %1413 = vrot.lane.b32.xlu0 %v794_v46, %s2372_s10  ;;  %v796_v50 = vadd.f32 %v783_v49, %v165_v43  ;;  %v785_v51 = vpop.f32.mrb[1].mxu1  ;;  %v1411_v1 = vmul.f32 %v2597_v62, %v794_v46  ;;  %v1405_v49 = vld [vmem:[%s2711_s9] sm:$0xff] }
 0x1ed   :  { %v635_v41 = vpop.f32.mrb[2].mxu0  ;;  %v2585_v52 = vadd.f32 %v785_v51, %v169_v45  ;;  %v1425_v22 = vmul.f32 %v2597_v62, %v795_v60 }
 0x1ee   :  { %v798_v54 = vadd.f32 %v635_v41, %v157_v42  ;;  %v637_v55 = vpop.f32.mrb[3].mxu0  ;;  %v1439_v12 = vmul.f32 %v2597_v62, %v796_v50 }
 0x1ef   :  { %v789_v56 = vpop.f32.mrb[2].mxu1  ;;  %v799_v61 = vadd.f32 %v637_v55, %v161_v53 }
 0x1f0   :  { %1415 = vrot.lane.b32.xlu1 %v798_v54, %s2372_s10  ;;  %1441 = vrot.lane.b32.xlu0 %v796_v50, %s2372_s10  ;;  %v800_v57 = vadd.f32 %v789_v56, %v165_v43  ;;  %v791_v58 = vpop.f32.mrb[3].mxu1  ;;  %v1412_v11 = vmul.f32 %v2606_v3, %v798_v54  ;;  %v1407_v50 = vld [vmem:[#allocation17] sm:$0xff]  ;;  %v1406_v56 = vld [vmem:[%s2711_s9 + $0x8] sm:$0xff]  ;;  %s2278_s9 = scalar_lea.vmem %s1519_s20, 512 }
 0x1f1   :  { %v2589_v59 = vadd.f32 %v791_v58, %v169_v45  ;;  %v1426_v32 = vmul.f32 %v2606_v3, %v799_v61  ;;  %v1408_v58 = vld [vmem:[#allocation17 + $0x8] sm:$0xff]  ;;  %p2279_p8 = scmp.ne.s32.totalorder %s1519_s20, %s2278_s9  ;;  %p2284_p10 = scmp.lt.s32.totalorder %s2278_s9, %s2278_s9 }
 0x1f2   :  { %v1440_v23 = vmul.f32 %v2606_v3, %v800_v57 }
 0x1f3   :  { %p2285_p11 = por %p2284_p10, %p2283_p9 }
 0x1f4   :  { %1443 = vrot.lane.b32.xlu1 %v800_v57, %s2372_s10  ;;  %1427 = vrot.lane.b32.xlu0 %v795_v60, %s2372_s10 }
 0x1f5   :  { %p2286_p12 = pnand %p2285_p11, %p2279_p8 }
 0x1f8   :  { %1429 = vrot.lane.b32.xlu1 %v799_v61, %s2372_s10 }
 0x25e   :  { %v1414_v0 = vpop.permute.xlu0 %1413 }
 0x25f   :  { %v1417_v2 = vmul.f32 %v1414_v0, %v2599_v63 }
 0x261   :  { %v1419_v5 = vadd.f32 %v1417_v2, %v1411_v1 }
 0x262   :  { %v1416_v6 = vpop.permute.xlu1 %1415  ;;  %v1442_v7 = vpop.permute.xlu0 %1441 }
 0x263   :  { %1421 = vst [vmem:[#allocation19] sm:$0xff] %v1419_v5  ;;  %v1418_v8 = vmul.f32 %v1416_v6, %v2608_v4  ;;  %v1445_v13 = vmul.f32 %v1442_v7, %v2599_v63 }
 0x265   :  { %v1420_v15 = vadd.f32 %v1418_v8, %v1412_v11  ;;  %v1447_v10 = vadd.f32 %v1445_v13, %v1439_v12  ;;  %v1453_v13 = vmul.f32 %v2597_v62, %v2585_v52 }
 0x266   :  { %v1444_v17 = vpop.permute.xlu1 %1443  ;;  %v1428_v18 = vpop.permute.xlu0 %1427 }
 0x267   :  { %1422 = vst [vmem:[#allocation19 + $0x20] sm:$0xff] %v1420_v15  ;;  %1449 = vst [vmem:[#allocation19 + $0x10] sm:$0xff] %v1447_v10  ;;  %v1446_v9 = vmul.f32 %v1444_v17, %v2608_v4  ;;  %v1431_v24 = vmul.f32 %v1428_v18, %v2599_v63  ;;  %v1454_v10 = vmul.f32 %v2606_v3, %v2589_v59 }
 0x269   :  { %v1448_v26 = vadd.f32 %v1446_v9, %v1440_v23  ;;  %v1433_v20 = vadd.f32 %v1431_v24, %v1425_v22  ;;  %v1085_v27 = vpop.f32.mrb[4].mxu0 }
 0x26a   :  { %v1096_v29 = vadd.f32 %v1085_v27, %v187_v19  ;;  %v1087_v30 = vpop.f32.mrb[5].mxu0  ;;  %v1430_v31 = vpop.permute.xlu1 %1429 }
 0x26b   :  { %1450 = vst [vmem:[#allocation19 + $0x30] sm:$0xff] %v1448_v26  ;;  %1435 = vst [vmem:[#allocation19 + $0x8] sm:$0xff] %v1433_v20  ;;  %v1097_v33 = vadd.f32 %v1087_v30, %v191_v21  ;;  %v1432_v34 = vmul.f32 %v1430_v31, %v2608_v4  ;;  %v1379_v35 = vpop.f32.mrb[4].mxu1 }
 0x26c   :  { %1469 = vrot.lane.b32.xlu0 %v1096_v29, %s2372_s10  ;;  %v1390_v36 = vadd.f32 %v1379_v35, %v203_v25  ;;  %v1381_v38 = vpop.f32.mrb[5].mxu1  ;;  %v1467_v41 = vmul.f32 %v1405_v49, %v1096_v29 }
 0x26d   :  { %v1434_v37 = vadd.f32 %v1432_v34, %v1426_v32  ;;  %v1091_v39 = vpop.f32.mrb[6].mxu0  ;;  %1483 = vrot.lane.b32.xlu1 %v1097_v33, %s2372_s10  ;;  %v1391_v40 = vadd.f32 %v1381_v38, %v207_v28  ;;  %v1481_v55 = vmul.f32 %v1405_v49, %v1097_v33 }
 0x26e   :  { %v1098_v42 = vadd.f32 %v1091_v39, %v187_v19  ;;  %v1093_v43 = vpop.f32.mrb[7].mxu0  ;;  %1497 = vst [vmem:[#allocation22] sm:$0xff] %v1390_v36 }
 0x26f   :  { %1436 = vst [vmem:[#allocation19 + $0x28] sm:$0xff] %v1434_v37  ;;  %v1099_v44 = vadd.f32 %v1093_v43, %v191_v21  ;;  %1498 = vst [vmem:[#allocation22 + $0x8] sm:$0xff] %v1391_v40  ;;  %v1385_v45 = vpop.f32.mrb[6].mxu1 }
 0x270   :  { %1471 = vrot.lane.b32.xlu0 %v1098_v42, %s2372_s10  ;;  %v1392_v46 = vadd.f32 %v1385_v45, %v203_v25  ;;  %v1387_v47 = vpop.f32.mrb[7].mxu1  ;;  %v1468_v1 = vmul.f32 %v1406_v56, %v1098_v42 }
 0x271   :  { %1485 = vrot.lane.b32.xlu1 %v1099_v44, %s2372_s10  ;;  %v1393_v48 = vadd.f32 %v1387_v47, %v207_v28  ;;  %v1482_v6 = vmul.f32 %v1406_v56, %v1099_v44 }
 0x272   :  { %1499 = vst [vmem:[#allocation22 + $0x10] sm:$0xff] %v1392_v46 }
 0x273   :  { %1500 = vst [vmem:[#allocation22 + $0x18] sm:$0xff] %v1393_v48 }
 0x274   :  { %1455 = vrot.lane.b32.xlu0 %v2585_v52, %s2372_s10 }
 0x275   :  { %1457 = vrot.lane.b32.xlu1 %v2589_v59, %s2372_s10 }
 0x2de   :  { %v1470_v51 = vpop.permute.xlu0 %1469 }
 0x2df   :  { %v1473_v53 = vmul.f32 %v1470_v51, %v1407_v50  ;;  %v1484_v54 = vpop.permute.xlu1 %1483 }
 0x2e0   :  { %v1487_v57 = vmul.f32 %v1484_v54, %v1407_v50 }
 0x2e1   :  { %v1475_v60 = vadd.f32 %v1473_v53, %v1467_v41 }
 0x2e2   :  { %v1489_v61 = vadd.f32 %v1487_v57, %v1481_v55  ;;  %v1472_v0 = vpop.permute.xlu0 %1471 }
 0x2e3   :  { %1477 = vst [vmem:[#allocation20] sm:$0xff] %v1475_v60  ;;  %v1474_v2 = vmul.f32 %v1472_v0, %v1408_v58  ;;  %v1486_v5 = vpop.permute.xlu1 %1485 }
 0x2e4   :  { %1491 = vst [vmem:[#allocation20 + $0x8] sm:$0xff] %v1489_v61  ;;  %v1488_v7 = vmul.f32 %v1486_v5, %v1408_v58 }
 0x2e5   :  { %v1476_v11 = vadd.f32 %v1474_v2, %v1468_v1 }
 0x2e6   :  { %v1490_v12 = vadd.f32 %v1488_v7, %v1482_v6  ;;  %v1456_v8 = vpop.permute.xlu0 %1455 }
 0x2e7   :  { %1478 = vst [vmem:[#allocation20 + $0x10] sm:$0xff] %v1476_v11  ;;  %v1459_v14 = vmul.f32 %v1456_v8, %v2599_v63  ;;  %v1458_v15 = vpop.permute.xlu1 %1457 }
 0x2e8   :  { %1492 = vst [vmem:[#allocation20 + $0x18] sm:$0xff] %v1490_v12  ;;  %v1460_v16 = vmul.f32 %v1458_v15, %v2608_v4 }
 0x2e9   :  { %v1461_v17 = vadd.f32 %v1459_v14, %v1453_v13 }
 0x2ea   :  { %2289 = shalt.err (!%p2286_p12)
}
 0x2eb   :  { %s2290_s0 = scalar_lea.hbm %s2714_s12, 512 }
 0x2ec   :  { %p2291_p13 = scmp.ne.s32.totalorder %s2714_s12, %s2290_s0  ;;  %p2294_p0 = scmp.lt.u32.totalorder %s2290_s0, %s2714_s12 }
 0x2ee   :  { %p2296_p1 = pnand %p2294_p0, %p2291_p13 }
 0x2f0   :  { %2299 = shalt.err (!%p2296_p1)
}
 0x2f1   :  { %1524 = dma.vmem_to_hbm [thread:$0]  %s1519_s20, 512, %s2714_s12, [#allocation21], %s2363_s26, %s2363_s26, %s2364_s17   ;;  %v1462_v52 = vadd.f32 %v1460_v16, %v1454_v10 }
 0x2f2   :  { %s2300_s25 = scalar_lea.vmem %s2640_s2, 512  ;;  %p2305_p3 = scmp.lt.s32.totalorder %s2640_s2, %s2640_s2 }
 0x2f3   :  { %p2301_p2 = scmp.ne.s32.totalorder %s2640_s2, %s2300_s25  ;;  %p2306_p4 = scmp.lt.s32.totalorder %s2300_s25, %s2300_s25 }
 0x2f5   :  { %p2307_p5 = por %p2306_p4, %p2305_p3 }
 0x2f7   :  { %p2308_p6 = pnand %p2307_p5, %p2301_p2 }
 0x2f9   :  { %2311 = shalt.err (!%p2308_p6)
}
 0x2fa   :  { %s2312_s30 = scalar_lea.hbm %s2715_s13, 512 }
 0x2fb   :  { %p2313_p7 = scmp.ne.s32.totalorder %s2715_s13, %s2312_s30  ;;  %p2316_p8 = scmp.lt.u32.totalorder %s2312_s30, %s2715_s13 }
 0x2fd   :  { %p2318_p9 = pnand %p2316_p8, %p2313_p7 }
 0x2ff   :  { %2321 = shalt.err (!%p2318_p9)
}
 0x300   :  { %1536 = dma.vmem_to_hbm [thread:$0]  %s2640_s2, 512, %s2715_s13, [#allocation21], %s2363_s26, %s2363_s26, %s2364_s17   ;;  %1463 = vst [vmem:[#allocation19 + $0x18] sm:$0xff] %v1461_v17  ;;  %1464 = vst [vmem:[#allocation19 + $0x38] sm:$0xff] %v1462_v52 }
 0x301   :  { %s2322_s20 = scalar_lea.vmem %s2645_s24, 1024  ;;  %p2327_p11 = scmp.lt.s32.totalorder %s2645_s24, %s2645_s24 }
 0x302   :  { %p2323_p10 = scmp.ne.s32.totalorder %s2645_s24, %s2322_s20  ;;  %p2328_p12 = scmp.lt.s32.totalorder %s2322_s20, %s2322_s20 }
 0x304   :  { %p2329_p13 = por %p2328_p12, %p2327_p11 }
 0x306   :  { %p2330_p0 = pnand %p2329_p13, %p2323_p10 }
 0x308   :  { %2333 = shalt.err (!%p2330_p0)
}
 0x309   :  { %s2334_s9 = scalar_lea.hbm %s2713_s11, 1024 }
 0x30a   :  { %p2335_p1 = scmp.ne.s32.totalorder %s2713_s11, %s2334_s9  ;;  %p2338_p2 = scmp.lt.u32.totalorder %s2334_s9, %s2713_s11 }
 0x30c   :  { %p2340_p3 = pnand %p2338_p2, %p2335_p1 }
 0x30e   :  { %2343 = shalt.err (!%p2340_p3)
}
 0x30f   :  { %1512 = dma.vmem_to_hbm [thread:$0]  %s2645_s24, 1024, %s2713_s11, [#allocation7], %s2359_s18, %s2359_s18, %s2360_s19  }
 0x310   :  { %2354 = dma.done.wait [#allocation7], 1024  }
 0x311   :  { %2355 = vsyncadd [#allocation7], 4294966272 }
 0x312   :  { %2356 = dma.done.wait [#allocation21], 1024  }
 0x313   :  { %2357 = vsyncadd [#allocation21], 4294966272 }
 0x314   :  { %1546 = vsyncpa [#allocation6], 1 }
 0x315   :  { %1547 = vsyncpa [#allocation9], 1 }
 0x316   :  { %1548 = vsyncpa [#allocation12], 1 }
 0x317   :  { %1549 = vsyncpa [#allocation15], 1 }
 0x318   :  { %1550 = vsyncpa [#allocation18], 1 }
 0x319   :  { %1551 = vsyncpa [#allocation7], 1 }
 0x31a   :  { %1552 = vsyncpa [#allocation21], 1 }

</bundles_post_ra>
